<compile_context>
chip_gen: v7x
topology: tpu7x:2x2x1
jax: 0.10.0
libtpu: 0.0.40
codegen_flags: <defaults>
</compile_context>

<pallas_src>
import math
from functools import partial

import jax
import jax.numpy as jnp
from jax.experimental import pallas as pl
from jax.experimental.pallas import tpu as pltpu  # noqa: F401  (TPU backend)

# ------------------------- small config -------------------------
BATCH = 2
SEQ = 8
HIDDEN = 32
NUM_HEADS = 2
HEAD_DIM = HIDDEN // NUM_HEADS
INTERMEDIATE = 64
NUM_LAYERS = 2
VOCAB = 64
MAX_POS = 16
NUM_LABELS = 2
LANE_PAD = 128            # lane-dense padded logits width (>= NUM_LABELS)
LN_EPS = 1e-12
NEG_INF = -10000.0
POOLING = "first"         # matches the module's default (else) branch: output[:, 0, :]


# ------------------------- in-kernel helpers (f32 math) -------------------------
def _layer_norm(x, g, b):
    mean = jnp.mean(x, axis=-1, keepdims=True)
    var = jnp.mean(jnp.square(x - mean), axis=-1, keepdims=True)
    return (x - mean) * jax.lax.rsqrt(var + LN_EPS) * g + b


def _erf(x):
    # Abramowitz & Stegun 7.1.26 rational approximation (|err| < 1.5e-7).
    # Built only from abs/exp/mul/add/div/where so it lowers on every TPU gen;
    # gives the exact-erf GELU behaviour of HF BERT (not the tanh approximation).
    a1, a2, a3, a4, a5 = (0.254829592, -0.284496736, 1.421413741,
                          -1.453152027, 1.061405429)
    p = 0.3275911
    z = jnp.abs(x)
    t = 1.0 / (1.0 + p * z)
    poly = ((((a5 * t + a4) * t + a3) * t + a2) * t + a1) * t
    y = 1.0 - poly * jnp.exp(-z * z)
    return jnp.where(x >= 0.0, y, -y)


def _gelu_exact(x):
    return 0.5 * x * (1.0 + _erf(x * (1.0 / math.sqrt(2.0))))


# ------------------------- the single fused kernel -------------------------
def fused_bert_kernel(ids_ref, mask_ref, wte_ref, pte_ref, tte_ref,
                      eg_ref, eb_ref,
                      wq_ref, bq_ref, wk_ref, bk_ref, wv_ref, bv_ref,
                      wo_ref, bo_ref, ln1g_ref, ln1b_ref,
                      w1_ref, b1_ref, w2_ref, b2_ref, ln2g_ref, ln2b_ref,
                      cw1_ref, cb1_ref, cw2_ref, cb2_ref,
                      o_ref, *, pooling):
    scale = 1.0 / math.sqrt(HEAD_DIM)

    # ----- embeddings, fully in-kernel: one-hot MXU "gather" + pos/type + LN -----
    ids = ids_ref[...]                                               # (B*S, 1) int32
    iota = jax.lax.broadcasted_iota(jnp.int32, (BATCH * SEQ, VOCAB), 1)
    one_hot = jnp.where(iota == ids, 1.0, 0.0)                       # (B*S, V) f32
    word = jnp.dot(one_hot, wte_ref[...], preferred_element_type=jnp.float32)
    # TODO(synk): single-segment inputs assumed (token_type id 0 everywhere).
    pos_type = pte_ref[0:SEQ, :] + tte_ref[0:1, :]                   # (S, H) f32
    emb = (word.reshape(BATCH, SEQ, HIDDEN) + pos_type[None, :, :]
           ).reshape(BATCH * SEQ, HIDDEN)
    x = _layer_norm(emb, eg_ref[...], eb_ref[...])                   # (B*S, H) f32

    # Additive attention bias from the padding mask (broadcast over query dim).
    bias = ((1.0 - mask_ref[...].astype(jnp.float32)) * NEG_INF)[:, None, :]  # (B,1,S)

    for l in range(NUM_LAYERS):                            # static unroll, weights resident
        xb = x.astype(jnp.bfloat16)
        attn = jnp.zeros((BATCH * SEQ, HIDDEN), jnp.float32)
        for h in range(NUM_HEADS):                         # per-head weights: no lane slicing
            q = jnp.dot(xb, wq_ref[l, h], preferred_element_type=jnp.float32) + bq_ref[l, h]
            k = jnp.dot(xb, wk_ref[l, h], preferred_element_type=jnp.float32) + bk_ref[l, h]
            v = jnp.dot(xb, wv_ref[l, h], preferred_element_type=jnp.float32) + bv_ref[l, h]
            # (B*S, HD) -> (B, S, HD): sublane-tile aligned split (S == 8), cheap.
            q3 = q.reshape(BATCH, SEQ, HEAD_DIM).astype(jnp.bfloat16)
            k3 = k.reshape(BATCH, SEQ, HEAD_DIM).astype(jnp.bfloat16)
            v3 = v.reshape(BATCH, SEQ, HEAD_DIM).astype(jnp.bfloat16)
            s = jnp.einsum("bqd,bkd->bqk", q3, k3,
                           preferred_element_type=jnp.float32) * scale + bias
            s = s - jnp.max(s, axis=-1, keepdims=True)     # stable softmax, f32
            p = jnp.exp(s)
            p = p * pl.reciprocal(jnp.sum(p, axis=-1, keepdims=True), approx=True)
            ctx = jnp.einsum("bqk,bkd->bqd", p.astype(jnp.bfloat16), v3,
                             preferred_element_type=jnp.float32)
            ctx = ctx.reshape(BATCH * SEQ, HEAD_DIM).astype(jnp.bfloat16)
            # Per-head chunk of the output projection; summing over heads is
            # mathematically identical to concat(ctx_heads) @ Wo (no concat).
            attn = attn + jnp.dot(ctx, wo_ref[l, h], preferred_element_type=jnp.float32)
        attn = attn + bo_ref[l]
        h1 = _layer_norm(x + attn, ln1g_ref[l], ln1b_ref[l])

        ff = jnp.dot(h1.astype(jnp.bfloat16), w1_ref[l],
                     preferred_element_type=jnp.float32) + b1_ref[l]
        ff = _gelu_exact(ff)
        ff = jnp.dot(ff.astype(jnp.bfloat16), w2_ref[l],
                     preferred_element_type=jnp.float32) + b2_ref[l]
        x = _layer_norm(h1 + ff, ln2g_ref[l], ln2b_ref[l])

    # ----- pooling ('first' is the module's default/else branch) -----
    x3 = x.reshape(BATCH, SEQ, HIDDEN)
    if pooling == "mean":
        pooled = jnp.mean(x3, axis=1)
    elif pooling == "max":
        pooled = jnp.max(x3, axis=1)
    elif pooling == "last":
        pooled = x3[:, SEQ - 1, :]
    else:                                                  # 'first' / default
        pooled = x3[:, 0, :]

    # ----- classifier: Linear -> ReLU -> Linear (weights padded to 128 lanes) -----
    hc = jnp.dot(pooled.astype(jnp.bfloat16), cw1_ref[...],
                 preferred_element_type=jnp.float32) + cb1_ref[...]
    hc = jnp.maximum(hc, 0.0)                              # ReLU
    logits = jnp.dot(hc.astype(jnp.bfloat16), cw2_ref[...],
                     preferred_element_type=jnp.float32) + cb2_ref[...]
    o_ref[...] = logits                                    # lane-dense (B, 128) store


# ------------------------- parameter init (synthetic, deterministic) -------------------------
def init_params(key):
    std = 0.02
    keys = iter(jax.random.split(key, 16))

    def normal(shape):
        return jax.random.normal(next(keys), shape, jnp.float32) * std

    params = {
        "word_emb": normal((VOCAB, HIDDEN)),
        "pos_emb": normal((MAX_POS, HIDDEN)),
        "type_emb": normal((2, HIDDEN)),
        "emb_ln_g": jnp.ones((1, HIDDEN), jnp.float32),
        "emb_ln_b": jnp.zeros((1, HIDDEN), jnp.float32),
        # Attention weights stored per (layer, head) so the kernel never slices
        # lanes; matmul operands in bf16 (f32 accumulation), biases/LN in f32.
        "wq": normal((NUM_LAYERS, NUM_HEADS, HIDDEN, HEAD_DIM)).astype(jnp.bfloat16),
        "wk": normal((NUM_LAYERS, NUM_HEADS, HIDDEN, HEAD_DIM)).astype(jnp.bfloat16),
        "wv": normal((NUM_LAYERS, NUM_HEADS, HIDDEN, HEAD_DIM)).astype(jnp.bfloat16),
        "bq": jnp.zeros((NUM_LAYERS, NUM_HEADS, 1, HEAD_DIM), jnp.float32),
        "bk": jnp.zeros((NUM_LAYERS, NUM_HEADS, 1, HEAD_DIM), jnp.float32),
        "bv": jnp.zeros((NUM_LAYERS, NUM_HEADS, 1, HEAD_DIM), jnp.float32),
        "wo": normal((NUM_LAYERS, NUM_HEADS, HEAD_DIM, HIDDEN)).astype(jnp.bfloat16),
        "bo": jnp.zeros((NUM_LAYERS, 1, HIDDEN), jnp.float32),
        "ln1_g": jnp.ones((NUM_LAYERS, 1, HIDDEN), jnp.float32),
        "ln1_b": jnp.zeros((NUM_LAYERS, 1, HIDDEN), jnp.float32),
        "w1": normal((NUM_LAYERS, HIDDEN, INTERMEDIATE)).astype(jnp.bfloat16),
        "b1": jnp.zeros((NUM_LAYERS, 1, INTERMEDIATE), jnp.float32),
        "w2": normal((NUM_LAYERS, INTERMEDIATE, HIDDEN)).astype(jnp.bfloat16),
        "b2": jnp.zeros((NUM_LAYERS, 1, HIDDEN), jnp.float32),
        "ln2_g": jnp.ones((NUM_LAYERS, 1, HIDDEN), jnp.float32),
        "ln2_b": jnp.zeros((NUM_LAYERS, 1, HIDDEN), jnp.float32),
        "cls_w1": normal((HIDDEN, HIDDEN)).astype(jnp.bfloat16),
        "cls_b1": jnp.zeros((1, HIDDEN), jnp.float32),
    }
    # Classifier output projection zero-padded to a lane-dense 128-wide slab.
    w2c = normal((HIDDEN, NUM_LABELS))
    params["cls_w2"] = jnp.pad(
        w2c, ((0, 0), (0, LANE_PAD - NUM_LABELS))).astype(jnp.bfloat16)
    params["cls_b2"] = jnp.zeros((1, LANE_PAD), jnp.float32)
    return params


# ------------------------- full forward -------------------------
def bert_for_da_forward(params, input_ids, masks, pooling=POOLING):
    """input_ids: [B, S] int32 token ids; masks: [B, S] (1 = token, 0 = pad)."""
    B, S = input_ids.shape
    ids = input_ids.reshape(B * S, 1).astype(jnp.int32)     # batch folded into M

    logits_pad = pl.pallas_call(
        partial(fused_bert_kernel, pooling=pooling),
        out_shape=jax.ShapeDtypeStruct((B, LANE_PAD), jnp.float32),
    )(ids, masks.astype(jnp.float32),
      params["word_emb"], params["pos_emb"], params["type_emb"],
      params["emb_ln_g"], params["emb_ln_b"],
      params["wq"], params["bq"], params["wk"], params["bk"],
      params["wv"], params["bv"], params["wo"], params["bo"],
      params["ln1_g"], params["ln1_b"],
      params["w1"], params["b1"], params["w2"], params["b2"],
      params["ln2_g"], params["ln2_b"],
      params["cls_w1"], params["cls_b1"], params["cls_w2"], params["cls_b2"])
    return logits_pad[:, :NUM_LABELS]


# ------------------------- main -------------------------
if __name__ == "__main__":
    key = jax.random.PRNGKey(0)
    k_params, k_src = jax.random.split(key)

    params = init_params(k_params)
    input_ids = jax.random.randint(k_src, (BATCH, SEQ), 0, VOCAB, dtype=jnp.int32)
    masks = jnp.ones((BATCH, SEQ), jnp.float32).at[0, SEQ - 2:].set(0.0)  # some padding

    forward = jax.jit(bert_for_da_forward)
    logits = jax.block_until_ready(forward(params, input_ids, masks))

    assert logits.shape == (BATCH, NUM_LABELS), logits.shape
    assert bool(jnp.all(jnp.isfinite(logits)))
    print("KERNEL_OK")
</pallas_src>

<mosaic_0001>
module attributes {stable_mosaic.version = 11 : i64} {
  func.func @fused_bert_kernel(%arg0: memref<16x1xi32, #tpu.memory_space<vmem>>, %arg1: memref<2x8xf32, #tpu.memory_space<vmem>>, %arg2: memref<64x32xf32, #tpu.memory_space<vmem>>, %arg3: memref<16x32xf32, #tpu.memory_space<vmem>>, %arg4: memref<2x32xf32, #tpu.memory_space<vmem>>, %arg5: memref<1x32xf32, #tpu.memory_space<vmem>>, %arg6: memref<1x32xf32, #tpu.memory_space<vmem>>, %arg7: memref<2x2x32x16xbf16, #tpu.memory_space<vmem>>, %arg8: memref<2x2x1x16xf32, #tpu.memory_space<vmem>>, %arg9: memref<2x2x32x16xbf16, #tpu.memory_space<vmem>>, %arg10: memref<2x2x1x16xf32, #tpu.memory_space<vmem>>, %arg11: memref<2x2x32x16xbf16, #tpu.memory_space<vmem>>, %arg12: memref<2x2x1x16xf32, #tpu.memory_space<vmem>>, %arg13: memref<2x2x16x32xbf16, #tpu.memory_space<vmem>>, %arg14: memref<2x1x32xf32, #tpu.memory_space<vmem>>, %arg15: memref<2x1x32xf32, #tpu.memory_space<vmem>>, %arg16: memref<2x1x32xf32, #tpu.memory_space<vmem>>, %arg17: memref<2x32x64xbf16, #tpu.memory_space<vmem>>, %arg18: memref<2x1x64xf32, #tpu.memory_space<vmem>>, %arg19: memref<2x64x32xbf16, #tpu.memory_space<vmem>>, %arg20: memref<2x1x32xf32, #tpu.memory_space<vmem>>, %arg21: memref<2x1x32xf32, #tpu.memory_space<vmem>>, %arg22: memref<2x1x32xf32, #tpu.memory_space<vmem>>, %arg23: memref<32x32xbf16, #tpu.memory_space<vmem>>, %arg24: memref<1x32xf32, #tpu.memory_space<vmem>>, %arg25: memref<32x128xbf16, #tpu.memory_space<vmem>>, %arg26: memref<1x128xf32, #tpu.memory_space<vmem>>, %arg27: memref<2x128xf32, #tpu.memory_space<vmem>>) attributes {dimension_semantics = [], scalar_prefetch = 0 : i64, scratch_operands = 0 : i64, tpu.core_type = #tpu.core_type<tc>} {
    %c0 = arith.constant 0 : index
    %c0_0 = arith.constant 0 : index
    %0 = vector.load %arg0[%c0, %c0_0] : memref<16x1xi32, #tpu.memory_space<vmem>>, vector<16x1xi32>
    %1 = tpu.iota {dimensions = array<i32: 1>} : vector<16x64xi32>
    %2 = vector.broadcast %0 : vector<16x1xi32> to vector<16x64xi32>
    %3 = arith.cmpi eq, %1, %2 : vector<16x64xi32>
    %cst = arith.constant 1.000000e+00 : f32
    %cst_1 = arith.constant 0.000000e+00 : f32
    %4 = vector.broadcast %cst : f32 to vector<16x64xf32>
    %5 = vector.broadcast %cst_1 : f32 to vector<16x64xf32>
    %6 = arith.select %3, %4, %5 : vector<16x64xi1>, vector<16x64xf32>
    %c0_2 = arith.constant 0 : index
    %c0_3 = arith.constant 0 : index
    %7 = vector.load %arg2[%c0_2, %c0_3] : memref<64x32xf32, #tpu.memory_space<vmem>>, vector<64x32xf32>
    %cst_4 = arith.constant dense<0.000000e+00> : vector<16x32xf32>
    %8 = tpu.matmul %6, %7, %cst_4 {dimension_numbers = #tpu.dot_dimension_numbers<[1], [0], [0], [1], [0, 0, 1, 1], [], []>} : vector<16x64xf32>, vector<64x32xf32>, vector<16x32xf32> -> vector<16x32xf32>
    %c0_5 = arith.constant 0 : index
    %c0_6 = arith.constant 0 : index
    %9 = vector.load %arg3[%c0_5, %c0_6] : memref<16x32xf32, #tpu.memory_space<vmem>>, vector<8x32xf32>
    %c0_7 = arith.constant 0 : index
    %c0_8 = arith.constant 0 : index
    %10 = vector.load %arg4[%c0_7, %c0_8] : memref<2x32xf32, #tpu.memory_space<vmem>>, vector<1x32xf32>
    %11 = vector.broadcast %10 : vector<1x32xf32> to vector<8x32xf32>
    %12 = arith.addf %9, %11 : vector<8x32xf32>
    %13 = vector.shape_cast %8 : vector<16x32xf32> to vector<2x8x32xf32>
    %14 = vector.shape_cast %12 : vector<8x32xf32> to vector<1x8x32xf32>
    %15 = vector.broadcast %14 : vector<1x8x32xf32> to vector<2x8x32xf32>
    %16 = arith.addf %13, %15 : vector<2x8x32xf32>
    %17 = vector.shape_cast %16 : vector<2x8x32xf32> to vector<16x32xf32>
    %c0_9 = arith.constant 0 : index
    %c0_10 = arith.constant 0 : index
    %18 = vector.load %arg5[%c0_9, %c0_10] : memref<1x32xf32, #tpu.memory_space<vmem>>, vector<1x32xf32>
    %c0_11 = arith.constant 0 : index
    %c0_12 = arith.constant 0 : index
    %19 = vector.load %arg6[%c0_11, %c0_12] : memref<1x32xf32, #tpu.memory_space<vmem>>, vector<1x32xf32>
    %cst_13 = arith.constant dense<0.000000e+00> : vector<16xf32>
    %20 = vector.multi_reduction <add>, %17, %cst_13 [1] : vector<16x32xf32> to vector<16xf32>
    %21 = vector.shape_cast %20 : vector<16xf32> to vector<16x1xf32>
    %cst_14 = arith.constant 3.200000e+01 : f32
    %22 = vector.broadcast %cst_14 : f32 to vector<16x1xf32>
    %23 = arith.divf %21, %22 : vector<16x1xf32>
    %24 = vector.broadcast %23 : vector<16x1xf32> to vector<16x32xf32>
    %25 = arith.subf %17, %24 : vector<16x32xf32>
    %26 = arith.mulf %25, %25 : vector<16x32xf32>
    %cst_15 = arith.constant dense<0.000000e+00> : vector<16xf32>
    %27 = vector.multi_reduction <add>, %26, %cst_15 [1] : vector<16x32xf32> to vector<16xf32>
    %28 = vector.shape_cast %27 : vector<16xf32> to vector<16x1xf32>
    %cst_16 = arith.constant 3.200000e+01 : f32
    %29 = vector.broadcast %cst_16 : f32 to vector<16x1xf32>
    %30 = arith.divf %28, %29 : vector<16x1xf32>
    %31 = vector.broadcast %23 : vector<16x1xf32> to vector<16x32xf32>
    %32 = arith.subf %17, %31 : vector<16x32xf32>
    %cst_17 = arith.constant 9.99999996E-13 : f32
    %33 = vector.broadcast %cst_17 : f32 to vector<16x1xf32>
    %34 = arith.addf %30, %33 : vector<16x1xf32>
    %35 = math.rsqrt %34 : vector<16x1xf32>
    %36 = vector.broadcast %35 : vector<16x1xf32> to vector<16x32xf32>
    %37 = arith.mulf %32, %36 : vector<16x32xf32>
    %38 = vector.broadcast %18 : vector<1x32xf32> to vector<16x32xf32>
    %39 = arith.mulf %37, %38 : vector<16x32xf32>
    %40 = vector.broadcast %19 : vector<1x32xf32> to vector<16x32xf32>
    %41 = arith.addf %39, %40 : vector<16x32xf32>
    %c0_18 = arith.constant 0 : index
    %c0_19 = arith.constant 0 : index
    %42 = vector.load %arg1[%c0_18, %c0_19] : memref<2x8xf32, #tpu.memory_space<vmem>>, vector<2x8xf32>
    %cst_20 = arith.constant 1.000000e+00 : f32
    %43 = vector.broadcast %cst_20 : f32 to vector<2x8xf32>
    %44 = arith.subf %43, %42 : vector<2x8xf32>
    %cst_21 = arith.constant -1.000000e+04 : f32
    %45 = vector.broadcast %cst_21 : f32 to vector<2x8xf32>
    %46 = arith.mulf %44, %45 : vector<2x8xf32>
    %47 = vector.shape_cast %46 : vector<2x8xf32> to vector<2x1x8xf32>
    %48 = arith.truncf %41 : vector<16x32xf32> to vector<16x32xbf16>
    %cst_22 = arith.constant 0.000000e+00 : f32
    %49 = vector.broadcast %cst_22 : f32 to vector<16x32xf32>
    %c0_23 = arith.constant 0 : index
    %c0_24 = arith.constant 0 : index
    %c0_25 = arith.constant 0 : index
    %c0_26 = arith.constant 0 : index
    %50 = vector.load %arg7[%c0_23, %c0_24, %c0_25, %c0_26] : memref<2x2x32x16xbf16, #tpu.memory_space<vmem>>, vector<1x1x32x16xbf16>
    %51 = vector.shape_cast %50 : vector<1x1x32x16xbf16> to vector<32x16xbf16>
    %cst_27 = arith.constant dense<0.000000e+00> : vector<16x16xf32>
    %52 = tpu.matmul %48, %51, %cst_27 {dimension_numbers = #tpu.dot_dimension_numbers<[1], [0], [0], [1], [0, 0, 1, 1], [], []>} : vector<16x32xbf16>, vector<32x16xbf16>, vector<16x16xf32> -> vector<16x16xf32>
    %c0_28 = arith.constant 0 : index
    %c0_29 = arith.constant 0 : index
    %c0_30 = arith.constant 0 : index
    %c0_31 = arith.constant 0 : index
    %53 = vector.load %arg8[%c0_28, %c0_29, %c0_30, %c0_31] : memref<2x2x1x16xf32, #tpu.memory_space<vmem>>, vector<1x1x1x16xf32>
    %54 = vector.shape_cast %53 : vector<1x1x1x16xf32> to vector<1x16xf32>
    %55 = vector.broadcast %54 : vector<1x16xf32> to vector<16x16xf32>
    %56 = arith.addf %52, %55 : vector<16x16xf32>
    %c0_32 = arith.constant 0 : index
    %c0_33 = arith.constant 0 : index
    %c0_34 = arith.constant 0 : index
    %c0_35 = arith.constant 0 : index
    %57 = vector.load %arg9[%c0_32, %c0_33, %c0_34, %c0_35] : memref<2x2x32x16xbf16, #tpu.memory_space<vmem>>, vector<1x1x32x16xbf16>
    %58 = vector.shape_cast %57 : vector<1x1x32x16xbf16> to vector<32x16xbf16>
    %cst_36 = arith.constant dense<0.000000e+00> : vector<16x16xf32>
    %59 = tpu.matmul %48, %58, %cst_36 {dimension_numbers = #tpu.dot_dimension_numbers<[1], [0], [0], [1], [0, 0, 1, 1], [], []>} : vector<16x32xbf16>, vector<32x16xbf16>, vector<16x16xf32> -> vector<16x16xf32>
    %c0_37 = arith.constant 0 : index
    %c0_38 = arith.constant 0 : index
    %c0_39 = arith.constant 0 : index
    %c0_40 = arith.constant 0 : index
    %60 = vector.load %arg10[%c0_37, %c0_38, %c0_39, %c0_40] : memref<2x2x1x16xf32, #tpu.memory_space<vmem>>, vector<1x1x1x16xf32>
    %61 = vector.shape_cast %60 : vector<1x1x1x16xf32> to vector<1x16xf32>
    %62 = vector.broadcast %61 : vector<1x16xf32> to vector<16x16xf32>
    %63 = arith.addf %59, %62 : vector<16x16xf32>
    %c0_41 = arith.constant 0 : index
    %c0_42 = arith.constant 0 : index
    %c0_43 = arith.constant 0 : index
    %c0_44 = arith.constant 0 : index
    %64 = vector.load %arg11[%c0_41, %c0_42, %c0_43, %c0_44] : memref<2x2x32x16xbf16, #tpu.memory_space<vmem>>, vector<1x1x32x16xbf16>
    %65 = vector.shape_cast %64 : vector<1x1x32x16xbf16> to vector<32x16xbf16>
    %cst_45 = arith.constant dense<0.000000e+00> : vector<16x16xf32>
    %66 = tpu.matmul %48, %65, %cst_45 {dimension_numbers = #tpu.dot_dimension_numbers<[1], [0], [0], [1], [0, 0, 1, 1], [], []>} : vector<16x32xbf16>, vector<32x16xbf16>, vector<16x16xf32> -> vector<16x16xf32>
    %c0_46 = arith.constant 0 : index
    %c0_47 = arith.constant 0 : index
    %c0_48 = arith.constant 0 : index
    %c0_49 = arith.constant 0 : index
    %67 = vector.load %arg12[%c0_46, %c0_47, %c0_48, %c0_49] : memref<2x2x1x16xf32, #tpu.memory_space<vmem>>, vector<1x1x1x16xf32>
    %68 = vector.shape_cast %67 : vector<1x1x1x16xf32> to vector<1x16xf32>
    %69 = vector.broadcast %68 : vector<1x16xf32> to vector<16x16xf32>
    %70 = arith.addf %66, %69 : vector<16x16xf32>
    %71 = vector.shape_cast %56 : vector<16x16xf32> to vector<2x8x16xf32>
    %72 = arith.truncf %71 : vector<2x8x16xf32> to vector<2x8x16xbf16>
    %73 = vector.shape_cast %63 : vector<16x16xf32> to vector<2x8x16xf32>
    %74 = arith.truncf %73 : vector<2x8x16xf32> to vector<2x8x16xbf16>
    %75 = vector.shape_cast %70 : vector<16x16xf32> to vector<2x8x16xf32>
    %76 = arith.truncf %75 : vector<2x8x16xf32> to vector<2x8x16xbf16>
    "tpu.trace_start"() <{level = 10 : i32, message = "bqd,bkd->bqk"}> : () -> ()
    %cst_50 = arith.constant dense<0.000000e+00> : vector<2x8x8xf32>
    %77 = tpu.matmul %72, %74, %cst_50 {dimension_numbers = #tpu.dot_dimension_numbers<[2], [2], [1], [1], [0, 0, 0, 1, 1, 1], [0], [0]>} : vector<2x8x16xbf16>, vector<2x8x16xbf16>, vector<2x8x8xf32> -> vector<2x8x8xf32>
    "tpu.trace_stop"() : () -> ()
    %cst_51 = arith.constant 2.500000e-01 : f32
    %78 = vector.broadcast %cst_51 : f32 to vector<2x8x8xf32>
    %79 = arith.mulf %77, %78 : vector<2x8x8xf32>
    %80 = vector.broadcast %47 : vector<2x1x8xf32> to vector<2x8x8xf32>
    %81 = arith.addf %79, %80 : vector<2x8x8xf32>
    %cst_52 = arith.constant dense<0xFF800000> : vector<2x8xf32>
    %82 = vector.multi_reduction <maximumf>, %81, %cst_52 [2] : vector<2x8x8xf32> to vector<2x8xf32>
    %83 = vector.shape_cast %82 : vector<2x8xf32> to vector<2x8x1xf32>
    %84 = vector.broadcast %83 : vector<2x8x1xf32> to vector<2x8x8xf32>
    %85 = arith.subf %81, %84 : vector<2x8x8xf32>
    %86 = math.exp %85 : vector<2x8x8xf32>
    %cst_53 = arith.constant dense<0.000000e+00> : vector<2x8xf32>
    %87 = vector.multi_reduction <add>, %86, %cst_53 [2] : vector<2x8x8xf32> to vector<2x8xf32>
    %88 = vector.shape_cast %87 : vector<2x8xf32> to vector<2x8x1xf32>
    %89 = tpu.reciprocal %88 {approx = true} : vector<2x8x1xf32> -> vector<2x8x1xf32>
    %90 = vector.broadcast %89 : vector<2x8x1xf32> to vector<2x8x8xf32>
    %91 = arith.mulf %86, %90 : vector<2x8x8xf32>
    %92 = arith.truncf %91 : vector<2x8x8xf32> to vector<2x8x8xbf16>
    "tpu.trace_start"() <{level = 10 : i32, message = "bqk,bkd->bqd"}> : () -> ()
    %cst_54 = arith.constant dense<0.000000e+00> : vector<2x8x16xf32>
    %93 = tpu.matmul %92, %76, %cst_54 {dimension_numbers = #tpu.dot_dimension_numbers<[2], [1], [1], [2], [0, 0, 0, 1, 1, 2], [0], [0]>} : vector<2x8x8xbf16>, vector<2x8x16xbf16>, vector<2x8x16xf32> -> vector<2x8x16xf32>
    "tpu.trace_stop"() : () -> ()
    %94 = vector.shape_cast %93 : vector<2x8x16xf32> to vector<16x16xf32>
    %95 = arith.truncf %94 : vector<16x16xf32> to vector<16x16xbf16>
    %c0_55 = arith.constant 0 : index
    %c0_56 = arith.constant 0 : index
    %c0_57 = arith.constant 0 : index
    %c0_58 = arith.constant 0 : index
    %96 = vector.load %arg13[%c0_55, %c0_56, %c0_57, %c0_58] : memref<2x2x16x32xbf16, #tpu.memory_space<vmem>>, vector<1x1x16x32xbf16>
    %97 = vector.shape_cast %96 : vector<1x1x16x32xbf16> to vector<16x32xbf16>
    %cst_59 = arith.constant dense<0.000000e+00> : vector<16x32xf32>
    %98 = tpu.matmul %95, %97, %cst_59 {dimension_numbers = #tpu.dot_dimension_numbers<[1], [0], [0], [1], [0, 0, 1, 1], [], []>} : vector<16x16xbf16>, vector<16x32xbf16>, vector<16x32xf32> -> vector<16x32xf32>
    %99 = arith.addf %49, %98 : vector<16x32xf32>
    %c0_60 = arith.constant 0 : index
    %c1 = arith.constant 1 : index
    %c0_61 = arith.constant 0 : index
    %c0_62 = arith.constant 0 : index
    %100 = vector.load %arg7[%c0_60, %c1, %c0_61, %c0_62] : memref<2x2x32x16xbf16, #tpu.memory_space<vmem>>, vector<1x1x32x16xbf16>
    %101 = vector.shape_cast %100 : vector<1x1x32x16xbf16> to vector<32x16xbf16>
    %cst_63 = arith.constant dense<0.000000e+00> : vector<16x16xf32>
    %102 = tpu.matmul %48, %101, %cst_63 {dimension_numbers = #tpu.dot_dimension_numbers<[1], [0], [0], [1], [0, 0, 1, 1], [], []>} : vector<16x32xbf16>, vector<32x16xbf16>, vector<16x16xf32> -> vector<16x16xf32>
    %c0_64 = arith.constant 0 : index
    %c1_65 = arith.constant 1 : index
    %c0_66 = arith.constant 0 : index
    %c0_67 = arith.constant 0 : index
    %103 = vector.load %arg8[%c0_64, %c1_65, %c0_66, %c0_67] : memref<2x2x1x16xf32, #tpu.memory_space<vmem>>, vector<1x1x1x16xf32>
    %104 = vector.shape_cast %103 : vector<1x1x1x16xf32> to vector<1x16xf32>
    %105 = vector.broadcast %104 : vector<1x16xf32> to vector<16x16xf32>
    %106 = arith.addf %102, %105 : vector<16x16xf32>
    %c0_68 = arith.constant 0 : index
    %c1_69 = arith.constant 1 : index
    %c0_70 = arith.constant 0 : index
    %c0_71 = arith.constant 0 : index
    %107 = vector.load %arg9[%c0_68, %c1_69, %c0_70, %c0_71] : memref<2x2x32x16xbf16, #tpu.memory_space<vmem>>, vector<1x1x32x16xbf16>
    %108 = vector.shape_cast %107 : vector<1x1x32x16xbf16> to vector<32x16xbf16>
    %cst_72 = arith.constant dense<0.000000e+00> : vector<16x16xf32>
    %109 = tpu.matmul %48, %108, %cst_72 {dimension_numbers = #tpu.dot_dimension_numbers<[1], [0], [0], [1], [0, 0, 1, 1], [], []>} : vector<16x32xbf16>, vector<32x16xbf16>, vector<16x16xf32> -> vector<16x16xf32>
    %c0_73 = arith.constant 0 : index
    %c1_74 = arith.constant 1 : index
    %c0_75 = arith.constant 0 : index
    %c0_76 = arith.constant 0 : index
    %110 = vector.load %arg10[%c0_73, %c1_74, %c0_75, %c0_76] : memref<2x2x1x16xf32, #tpu.memory_space<vmem>>, vector<1x1x1x16xf32>
    %111 = vector.shape_cast %110 : vector<1x1x1x16xf32> to vector<1x16xf32>
    %112 = vector.broadcast %111 : vector<1x16xf32> to vector<16x16xf32>
    %113 = arith.addf %109, %112 : vector<16x16xf32>
    %c0_77 = arith.constant 0 : index
    %c1_78 = arith.constant 1 : index
    %c0_79 = arith.constant 0 : index
    %c0_80 = arith.constant 0 : index
    %114 = vector.load %arg11[%c0_77, %c1_78, %c0_79, %c0_80] : memref<2x2x32x16xbf16, #tpu.memory_space<vmem>>, vector<1x1x32x16xbf16>
    %115 = vector.shape_cast %114 : vector<1x1x32x16xbf16> to vector<32x16xbf16>
    %cst_81 = arith.constant dense<0.000000e+00> : vector<16x16xf32>
    %116 = tpu.matmul %48, %115, %cst_81 {dimension_numbers = #tpu.dot_dimension_numbers<[1], [0], [0], [1], [0, 0, 1, 1], [], []>} : vector<16x32xbf16>, vector<32x16xbf16>, vector<16x16xf32> -> vector<16x16xf32>
    %c0_82 = arith.constant 0 : index
    %c1_83 = arith.constant 1 : index
    %c0_84 = arith.constant 0 : index
    %c0_85 = arith.constant 0 : index
    %117 = vector.load %arg12[%c0_82, %c1_83, %c0_84, %c0_85] : memref<2x2x1x16xf32, #tpu.memory_space<vmem>>, vector<1x1x1x16xf32>
    %118 = vector.shape_cast %117 : vector<1x1x1x16xf32> to vector<1x16xf32>
    %119 = vector.broadcast %118 : vector<1x16xf32> to vector<16x16xf32>
    %120 = arith.addf %116, %119 : vector<16x16xf32>
    %121 = vector.shape_cast %106 : vector<16x16xf32> to vector<2x8x16xf32>
    %122 = arith.truncf %121 : vector<2x8x16xf32> to vector<2x8x16xbf16>
    %123 = vector.shape_cast %113 : vector<16x16xf32> to vector<2x8x16xf32>
    %124 = arith.truncf %123 : vector<2x8x16xf32> to vector<2x8x16xbf16>
    %125 = vector.shape_cast %120 : vector<16x16xf32> to vector<2x8x16xf32>
    %126 = arith.truncf %125 : vector<2x8x16xf32> to vector<2x8x16xbf16>
    "tpu.trace_start"() <{level = 10 : i32, message = "bqd,bkd->bqk"}> : () -> ()
    %cst_86 = arith.constant dense<0.000000e+00> : vector<2x8x8xf32>
    %127 = tpu.matmul %122, %124, %cst_86 {dimension_numbers = #tpu.dot_dimension_numbers<[2], [2], [1], [1], [0, 0, 0, 1, 1, 1], [0], [0]>} : vector<2x8x16xbf16>, vector<2x8x16xbf16>, vector<2x8x8xf32> -> vector<2x8x8xf32>
    "tpu.trace_stop"() : () -> ()
    %cst_87 = arith.constant 2.500000e-01 : f32
    %128 = vector.broadcast %cst_87 : f32 to vector<2x8x8xf32>
    %129 = arith.mulf %127, %128 : vector<2x8x8xf32>
    %130 = vector.broadcast %47 : vector<2x1x8xf32> to vector<2x8x8xf32>
    %131 = arith.addf %129, %130 : vector<2x8x8xf32>
    %cst_88 = arith.constant dense<0xFF800000> : vector<2x8xf32>
    %132 = vector.multi_reduction <maximumf>, %131, %cst_88 [2] : vector<2x8x8xf32> to vector<2x8xf32>
    %133 = vector.shape_cast %132 : vector<2x8xf32> to vector<2x8x1xf32>
    %134 = vector.broadcast %133 : vector<2x8x1xf32> to vector<2x8x8xf32>
    %135 = arith.subf %131, %134 : vector<2x8x8xf32>
    %136 = math.exp %135 : vector<2x8x8xf32>
    %cst_89 = arith.constant dense<0.000000e+00> : vector<2x8xf32>
    %137 = vector.multi_reduction <add>, %136, %cst_89 [2] : vector<2x8x8xf32> to vector<2x8xf32>
    %138 = vector.shape_cast %137 : vector<2x8xf32> to vector<2x8x1xf32>
    %139 = tpu.reciprocal %138 {approx = true} : vector<2x8x1xf32> -> vector<2x8x1xf32>
    %140 = vector.broadcast %139 : vector<2x8x1xf32> to vector<2x8x8xf32>
    %141 = arith.mulf %136, %140 : vector<2x8x8xf32>
    %142 = arith.truncf %141 : vector<2x8x8xf32> to vector<2x8x8xbf16>
    "tpu.trace_start"() <{level = 10 : i32, message = "bqk,bkd->bqd"}> : () -> ()
    %cst_90 = arith.constant dense<0.000000e+00> : vector<2x8x16xf32>
    %143 = tpu.matmul %142, %126, %cst_90 {dimension_numbers = #tpu.dot_dimension_numbers<[2], [1], [1], [2], [0, 0, 0, 1, 1, 2], [0], [0]>} : vector<2x8x8xbf16>, vector<2x8x16xbf16>, vector<2x8x16xf32> -> vector<2x8x16xf32>
    "tpu.trace_stop"() : () -> ()
    %144 = vector.shape_cast %143 : vector<2x8x16xf32> to vector<16x16xf32>
    %145 = arith.truncf %144 : vector<16x16xf32> to vector<16x16xbf16>
    %c0_91 = arith.constant 0 : index
    %c1_92 = arith.constant 1 : index
    %c0_93 = arith.constant 0 : index
    %c0_94 = arith.constant 0 : index
    %146 = vector.load %arg13[%c0_91, %c1_92, %c0_93, %c0_94] : memref<2x2x16x32xbf16, #tpu.memory_space<vmem>>, vector<1x1x16x32xbf16>
    %147 = vector.shape_cast %146 : vector<1x1x16x32xbf16> to vector<16x32xbf16>
    %cst_95 = arith.constant dense<0.000000e+00> : vector<16x32xf32>
    %148 = tpu.matmul %145, %147, %cst_95 {dimension_numbers = #tpu.dot_dimension_numbers<[1], [0], [0], [1], [0, 0, 1, 1], [], []>} : vector<16x16xbf16>, vector<16x32xbf16>, vector<16x32xf32> -> vector<16x32xf32>
    %149 = arith.addf %99, %148 : vector<16x32xf32>
    %c0_96 = arith.constant 0 : index
    %c0_97 = arith.constant 0 : index
    %c0_98 = arith.constant 0 : index
    %150 = vector.load %arg14[%c0_96, %c0_97, %c0_98] : memref<2x1x32xf32, #tpu.memory_space<vmem>>, vector<1x1x32xf32>
    %151 = vector.shape_cast %150 : vector<1x1x32xf32> to vector<1x32xf32>
    %152 = vector.broadcast %151 : vector<1x32xf32> to vector<16x32xf32>
    %153 = arith.addf %149, %152 : vector<16x32xf32>
    %154 = arith.addf %41, %153 : vector<16x32xf32>
    %c0_99 = arith.constant 0 : index
    %c0_100 = arith.constant 0 : index
    %c0_101 = arith.constant 0 : index
    %155 = vector.load %arg15[%c0_99, %c0_100, %c0_101] : memref<2x1x32xf32, #tpu.memory_space<vmem>>, vector<1x1x32xf32>
    %156 = vector.shape_cast %155 : vector<1x1x32xf32> to vector<1x32xf32>
    %c0_102 = arith.constant 0 : index
    %c0_103 = arith.constant 0 : index
    %c0_104 = arith.constant 0 : index
    %157 = vector.load %arg16[%c0_102, %c0_103, %c0_104] : memref<2x1x32xf32, #tpu.memory_space<vmem>>, vector<1x1x32xf32>
    %158 = vector.shape_cast %157 : vector<1x1x32xf32> to vector<1x32xf32>
    %cst_105 = arith.constant dense<0.000000e+00> : vector<16xf32>
    %159 = vector.multi_reduction <add>, %154, %cst_105 [1] : vector<16x32xf32> to vector<16xf32>
    %160 = vector.shape_cast %159 : vector<16xf32> to vector<16x1xf32>
    %cst_106 = arith.constant 3.200000e+01 : f32
    %161 = vector.broadcast %cst_106 : f32 to vector<16x1xf32>
    %162 = arith.divf %160, %161 : vector<16x1xf32>
    %163 = vector.broadcast %162 : vector<16x1xf32> to vector<16x32xf32>
    %164 = arith.subf %154, %163 : vector<16x32xf32>
    %165 = arith.mulf %164, %164 : vector<16x32xf32>
    %cst_107 = arith.constant dense<0.000000e+00> : vector<16xf32>
    %166 = vector.multi_reduction <add>, %165, %cst_107 [1] : vector<16x32xf32> to vector<16xf32>
    %167 = vector.shape_cast %166 : vector<16xf32> to vector<16x1xf32>
    %cst_108 = arith.constant 3.200000e+01 : f32
    %168 = vector.broadcast %cst_108 : f32 to vector<16x1xf32>
    %169 = arith.divf %167, %168 : vector<16x1xf32>
    %170 = vector.broadcast %162 : vector<16x1xf32> to vector<16x32xf32>
    %171 = arith.subf %154, %170 : vector<16x32xf32>
    %cst_109 = arith.constant 9.99999996E-13 : f32
    %172 = vector.broadcast %cst_109 : f32 to vector<16x1xf32>
    %173 = arith.addf %169, %172 : vector<16x1xf32>
    %174 = math.rsqrt %173 : vector<16x1xf32>
    %175 = vector.broadcast %174 : vector<16x1xf32> to vector<16x32xf32>
    %176 = arith.mulf %171, %175 : vector<16x32xf32>
    %177 = vector.broadcast %156 : vector<1x32xf32> to vector<16x32xf32>
    %178 = arith.mulf %176, %177 : vector<16x32xf32>
    %179 = vector.broadcast %158 : vector<1x32xf32> to vector<16x32xf32>
    %180 = arith.addf %178, %179 : vector<16x32xf32>
    %181 = arith.truncf %180 : vector<16x32xf32> to vector<16x32xbf16>
    %c0_110 = arith.constant 0 : index
    %c0_111 = arith.constant 0 : index
    %c0_112 = arith.constant 0 : index
    %182 = vector.load %arg17[%c0_110, %c0_111, %c0_112] : memref<2x32x64xbf16, #tpu.memory_space<vmem>>, vector<1x32x64xbf16>
    %183 = vector.shape_cast %182 : vector<1x32x64xbf16> to vector<32x64xbf16>
    %cst_113 = arith.constant dense<0.000000e+00> : vector<16x64xf32>
    %184 = tpu.matmul %181, %183, %cst_113 {dimension_numbers = #tpu.dot_dimension_numbers<[1], [0], [0], [1], [0, 0, 1, 1], [], []>} : vector<16x32xbf16>, vector<32x64xbf16>, vector<16x64xf32> -> vector<16x64xf32>
    %c0_114 = arith.constant 0 : index
    %c0_115 = arith.constant 0 : index
    %c0_116 = arith.constant 0 : index
    %185 = vector.load %arg18[%c0_114, %c0_115, %c0_116] : memref<2x1x64xf32, #tpu.memory_space<vmem>>, vector<1x1x64xf32>
    %186 = vector.shape_cast %185 : vector<1x1x64xf32> to vector<1x64xf32>
    %187 = vector.broadcast %186 : vector<1x64xf32> to vector<16x64xf32>
    %188 = arith.addf %184, %187 : vector<16x64xf32>
    %cst_117 = arith.constant 5.000000e-01 : f32
    %189 = vector.broadcast %cst_117 : f32 to vector<16x64xf32>
    %190 = arith.mulf %189, %188 : vector<16x64xf32>
    %cst_118 = arith.constant 0.707106769 : f32
    %191 = vector.broadcast %cst_118 : f32 to vector<16x64xf32>
    %192 = arith.mulf %188, %191 : vector<16x64xf32>
    %193 = math.absf %192 : vector<16x64xf32>
    %cst_119 = arith.constant 0.327591091 : f32
    %194 = vector.broadcast %cst_119 : f32 to vector<16x64xf32>
    %195 = arith.mulf %194, %193 : vector<16x64xf32>
    %cst_120 = arith.constant 1.000000e+00 : f32
    %196 = vector.broadcast %cst_120 : f32 to vector<16x64xf32>
    %197 = arith.addf %196, %195 : vector<16x64xf32>
    %cst_121 = arith.constant 1.000000e+00 : f32
    %198 = vector.broadcast %cst_121 : f32 to vector<16x64xf32>
    %199 = arith.divf %198, %197 : vector<16x64xf32>
    %cst_122 = arith.constant 1.06140542 : f32
    %200 = vector.broadcast %cst_122 : f32 to vector<16x64xf32>
    %201 = arith.mulf %200, %199 : vector<16x64xf32>
    %cst_123 = arith.constant -1.45315206 : f32
    %202 = vector.broadcast %cst_123 : f32 to vector<16x64xf32>
    %203 = arith.addf %201, %202 : vector<16x64xf32>
    %204 = arith.mulf %203, %199 : vector<16x64xf32>
    %cst_124 = arith.constant 1.42141378 : f32
    %205 = vector.broadcast %cst_124 : f32 to vector<16x64xf32>
    %206 = arith.addf %204, %205 : vector<16x64xf32>
    %207 = arith.mulf %206, %199 : vector<16x64xf32>
    %cst_125 = arith.constant -0.284496725 : f32
    %208 = vector.broadcast %cst_125 : f32 to vector<16x64xf32>
    %209 = arith.addf %207, %208 : vector<16x64xf32>
    %210 = arith.mulf %209, %199 : vector<16x64xf32>
    %cst_126 = arith.constant 0.254829586 : f32
    %211 = vector.broadcast %cst_126 : f32 to vector<16x64xf32>
    %212 = arith.addf %210, %211 : vector<16x64xf32>
    %213 = arith.mulf %212, %199 : vector<16x64xf32>
    %cst_127 = arith.constant 0.000000e+00 : f32
    %214 = vector.broadcast %cst_127 : f32 to vector<16x64xf32>
    %215 = arith.subf %214, %193 : vector<16x64xf32>
    %216 = arith.mulf %215, %193 : vector<16x64xf32>
    %217 = math.exp %216 : vector<16x64xf32>
    %218 = arith.mulf %213, %217 : vector<16x64xf32>
    %cst_128 = arith.constant 1.000000e+00 : f32
    %219 = vector.broadcast %cst_128 : f32 to vector<16x64xf32>
    %220 = arith.subf %219, %218 : vector<16x64xf32>
    %cst_129 = arith.constant 0.000000e+00 : f32
    %221 = vector.broadcast %cst_129 : f32 to vector<16x64xf32>
    %222 = arith.cmpf oge, %192, %221 : vector<16x64xf32>
    %cst_130 = arith.constant 0.000000e+00 : f32
    %223 = vector.broadcast %cst_130 : f32 to vector<16x64xf32>
    %224 = arith.subf %223, %220 : vector<16x64xf32>
    %225 = arith.select %222, %220, %224 : vector<16x64xi1>, vector<16x64xf32>
    %cst_131 = arith.constant 1.000000e+00 : f32
    %226 = vector.broadcast %cst_131 : f32 to vector<16x64xf32>
    %227 = arith.addf %226, %225 : vector<16x64xf32>
    %228 = arith.mulf %190, %227 : vector<16x64xf32>
    %229 = arith.truncf %228 : vector<16x64xf32> to vector<16x64xbf16>
    %c0_132 = arith.constant 0 : index
    %c0_133 = arith.constant 0 : index
    %c0_134 = arith.constant 0 : index
    %230 = vector.load %arg19[%c0_132, %c0_133, %c0_134] : memref<2x64x32xbf16, #tpu.memory_space<vmem>>, vector<1x64x32xbf16>
    %231 = vector.shape_cast %230 : vector<1x64x32xbf16> to vector<64x32xbf16>
    %cst_135 = arith.constant dense<0.000000e+00> : vector<16x32xf32>
    %232 = tpu.matmul %229, %231, %cst_135 {dimension_numbers = #tpu.dot_dimension_numbers<[1], [0], [0], [1], [0, 0, 1, 1], [], []>} : vector<16x64xbf16>, vector<64x32xbf16>, vector<16x32xf32> -> vector<16x32xf32>
    %c0_136 = arith.constant 0 : index
    %c0_137 = arith.constant 0 : index
    %c0_138 = arith.constant 0 : index
    %233 = vector.load %arg20[%c0_136, %c0_137, %c0_138] : memref<2x1x32xf32, #tpu.memory_space<vmem>>, vector<1x1x32xf32>
    %234 = vector.shape_cast %233 : vector<1x1x32xf32> to vector<1x32xf32>
    %235 = vector.broadcast %234 : vector<1x32xf32> to vector<16x32xf32>
    %236 = arith.addf %232, %235 : vector<16x32xf32>
    %237 = arith.addf %180, %236 : vector<16x32xf32>
    %c0_139 = arith.constant 0 : index
    %c0_140 = arith.constant 0 : index
    %c0_141 = arith.constant 0 : index
    %238 = vector.load %arg21[%c0_139, %c0_140, %c0_141] : memref<2x1x32xf32, #tpu.memory_space<vmem>>, vector<1x1x32xf32>
    %239 = vector.shape_cast %238 : vector<1x1x32xf32> to vector<1x32xf32>
    %c0_142 = arith.constant 0 : index
    %c0_143 = arith.constant 0 : index
    %c0_144 = arith.constant 0 : index
    %240 = vector.load %arg22[%c0_142, %c0_143, %c0_144] : memref<2x1x32xf32, #tpu.memory_space<vmem>>, vector<1x1x32xf32>
    %241 = vector.shape_cast %240 : vector<1x1x32xf32> to vector<1x32xf32>
    %cst_145 = arith.constant dense<0.000000e+00> : vector<16xf32>
    %242 = vector.multi_reduction <add>, %237, %cst_145 [1] : vector<16x32xf32> to vector<16xf32>
    %243 = vector.shape_cast %242 : vector<16xf32> to vector<16x1xf32>
    %cst_146 = arith.constant 3.200000e+01 : f32
    %244 = vector.broadcast %cst_146 : f32 to vector<16x1xf32>
    %245 = arith.divf %243, %244 : vector<16x1xf32>
    %246 = vector.broadcast %245 : vector<16x1xf32> to vector<16x32xf32>
    %247 = arith.subf %237, %246 : vector<16x32xf32>
    %248 = arith.mulf %247, %247 : vector<16x32xf32>
    %cst_147 = arith.constant dense<0.000000e+00> : vector<16xf32>
    %249 = vector.multi_reduction <add>, %248, %cst_147 [1] : vector<16x32xf32> to vector<16xf32>
    %250 = vector.shape_cast %249 : vector<16xf32> to vector<16x1xf32>
    %cst_148 = arith.constant 3.200000e+01 : f32
    %251 = vector.broadcast %cst_148 : f32 to vector<16x1xf32>
    %252 = arith.divf %250, %251 : vector<16x1xf32>
    %253 = vector.broadcast %245 : vector<16x1xf32> to vector<16x32xf32>
    %254 = arith.subf %237, %253 : vector<16x32xf32>
    %cst_149 = arith.constant 9.99999996E-13 : f32
    %255 = vector.broadcast %cst_149 : f32 to vector<16x1xf32>
    %256 = arith.addf %252, %255 : vector<16x1xf32>
    %257 = math.rsqrt %256 : vector<16x1xf32>
    %258 = vector.broadcast %257 : vector<16x1xf32> to vector<16x32xf32>
    %259 = arith.mulf %254, %258 : vector<16x32xf32>
    %260 = vector.broadcast %239 : vector<1x32xf32> to vector<16x32xf32>
    %261 = arith.mulf %259, %260 : vector<16x32xf32>
    %262 = vector.broadcast %241 : vector<1x32xf32> to vector<16x32xf32>
    %263 = arith.addf %261, %262 : vector<16x32xf32>
    %264 = arith.truncf %263 : vector<16x32xf32> to vector<16x32xbf16>
    %cst_150 = arith.constant 0.000000e+00 : f32
    %265 = vector.broadcast %cst_150 : f32 to vector<16x32xf32>
    %c1_151 = arith.constant 1 : index
    %c0_152 = arith.constant 0 : index
    %c0_153 = arith.constant 0 : index
    %c0_154 = arith.constant 0 : index
    %266 = vector.load %arg7[%c1_151, %c0_152, %c0_153, %c0_154] : memref<2x2x32x16xbf16, #tpu.memory_space<vmem>>, vector<1x1x32x16xbf16>
    %267 = vector.shape_cast %266 : vector<1x1x32x16xbf16> to vector<32x16xbf16>
    %cst_155 = arith.constant dense<0.000000e+00> : vector<16x16xf32>
    %268 = tpu.matmul %264, %267, %cst_155 {dimension_numbers = #tpu.dot_dimension_numbers<[1], [0], [0], [1], [0, 0, 1, 1], [], []>} : vector<16x32xbf16>, vector<32x16xbf16>, vector<16x16xf32> -> vector<16x16xf32>
    %c1_156 = arith.constant 1 : index
    %c0_157 = arith.constant 0 : index
    %c0_158 = arith.constant 0 : index
    %c0_159 = arith.constant 0 : index
    %269 = vector.load %arg8[%c1_156, %c0_157, %c0_158, %c0_159] : memref<2x2x1x16xf32, #tpu.memory_space<vmem>>, vector<1x1x1x16xf32>
    %270 = vector.shape_cast %269 : vector<1x1x1x16xf32> to vector<1x16xf32>
    %271 = vector.broadcast %270 : vector<1x16xf32> to vector<16x16xf32>
    %272 = arith.addf %268, %271 : vector<16x16xf32>
    %c1_160 = arith.constant 1 : index
    %c0_161 = arith.constant 0 : index
    %c0_162 = arith.constant 0 : index
    %c0_163 = arith.constant 0 : index
    %273 = vector.load %arg9[%c1_160, %c0_161, %c0_162, %c0_163] : memref<2x2x32x16xbf16, #tpu.memory_space<vmem>>, vector<1x1x32x16xbf16>
    %274 = vector.shape_cast %273 : vector<1x1x32x16xbf16> to vector<32x16xbf16>
    %cst_164 = arith.constant dense<0.000000e+00> : vector<16x16xf32>
    %275 = tpu.matmul %264, %274, %cst_164 {dimension_numbers = #tpu.dot_dimension_numbers<[1], [0], [0], [1], [0, 0, 1, 1], [], []>} : vector<16x32xbf16>, vector<32x16xbf16>, vector<16x16xf32> -> vector<16x16xf32>
    %c1_165 = arith.constant 1 : index
    %c0_166 = arith.constant 0 : index
    %c0_167 = arith.constant 0 : index
    %c0_168 = arith.constant 0 : index
    %276 = vector.load %arg10[%c1_165, %c0_166, %c0_167, %c0_168] : memref<2x2x1x16xf32, #tpu.memory_space<vmem>>, vector<1x1x1x16xf32>
    %277 = vector.shape_cast %276 : vector<1x1x1x16xf32> to vector<1x16xf32>
    %278 = vector.broadcast %277 : vector<1x16xf32> to vector<16x16xf32>
    %279 = arith.addf %275, %278 : vector<16x16xf32>
    %c1_169 = arith.constant 1 : index
    %c0_170 = arith.constant 0 : index
    %c0_171 = arith.constant 0 : index
    %c0_172 = arith.constant 0 : index
    %280 = vector.load %arg11[%c1_169, %c0_170, %c0_171, %c0_172] : memref<2x2x32x16xbf16, #tpu.memory_space<vmem>>, vector<1x1x32x16xbf16>
    %281 = vector.shape_cast %280 : vector<1x1x32x16xbf16> to vector<32x16xbf16>
    %cst_173 = arith.constant dense<0.000000e+00> : vector<16x16xf32>
    %282 = tpu.matmul %264, %281, %cst_173 {dimension_numbers = #tpu.dot_dimension_numbers<[1], [0], [0], [1], [0, 0, 1, 1], [], []>} : vector<16x32xbf16>, vector<32x16xbf16>, vector<16x16xf32> -> vector<16x16xf32>
    %c1_174 = arith.constant 1 : index
    %c0_175 = arith.constant 0 : index
    %c0_176 = arith.constant 0 : index
    %c0_177 = arith.constant 0 : index
    %283 = vector.load %arg12[%c1_174, %c0_175, %c0_176, %c0_177] : memref<2x2x1x16xf32, #tpu.memory_space<vmem>>, vector<1x1x1x16xf32>
    %284 = vector.shape_cast %283 : vector<1x1x1x16xf32> to vector<1x16xf32>
    %285 = vector.broadcast %284 : vector<1x16xf32> to vector<16x16xf32>
    %286 = arith.addf %282, %285 : vector<16x16xf32>
    %287 = vector.shape_cast %272 : vector<16x16xf32> to vector<2x8x16xf32>
    %288 = arith.truncf %287 : vector<2x8x16xf32> to vector<2x8x16xbf16>
    %289 = vector.shape_cast %279 : vector<16x16xf32> to vector<2x8x16xf32>
    %290 = arith.truncf %289 : vector<2x8x16xf32> to vector<2x8x16xbf16>
    %291 = vector.shape_cast %286 : vector<16x16xf32> to vector<2x8x16xf32>
    %292 = arith.truncf %291 : vector<2x8x16xf32> to vector<2x8x16xbf16>
    "tpu.trace_start"() <{level = 10 : i32, message = "bqd,bkd->bqk"}> : () -> ()
    %cst_178 = arith.constant dense<0.000000e+00> : vector<2x8x8xf32>
    %293 = tpu.matmul %288, %290, %cst_178 {dimension_numbers = #tpu.dot_dimension_numbers<[2], [2], [1], [1], [0, 0, 0, 1, 1, 1], [0], [0]>} : vector<2x8x16xbf16>, vector<2x8x16xbf16>, vector<2x8x8xf32> -> vector<2x8x8xf32>
    "tpu.trace_stop"() : () -> ()
    %cst_179 = arith.constant 2.500000e-01 : f32
    %294 = vector.broadcast %cst_179 : f32 to vector<2x8x8xf32>
    %295 = arith.mulf %293, %294 : vector<2x8x8xf32>
    %296 = vector.broadcast %47 : vector<2x1x8xf32> to vector<2x8x8xf32>
    %297 = arith.addf %295, %296 : vector<2x8x8xf32>
    %cst_180 = arith.constant dense<0xFF800000> : vector<2x8xf32>
    %298 = vector.multi_reduction <maximumf>, %297, %cst_180 [2] : vector<2x8x8xf32> to vector<2x8xf32>
    %299 = vector.shape_cast %298 : vector<2x8xf32> to vector<2x8x1xf32>
    %300 = vector.broadcast %299 : vector<2x8x1xf32> to vector<2x8x8xf32>
    %301 = arith.subf %297, %300 : vector<2x8x8xf32>
    %302 = math.exp %301 : vector<2x8x8xf32>
    %cst_181 = arith.constant dense<0.000000e+00> : vector<2x8xf32>
    %303 = vector.multi_reduction <add>, %302, %cst_181 [2] : vector<2x8x8xf32> to vector<2x8xf32>
    %304 = vector.shape_cast %303 : vector<2x8xf32> to vector<2x8x1xf32>
    %305 = tpu.reciprocal %304 {approx = true} : vector<2x8x1xf32> -> vector<2x8x1xf32>
    %306 = vector.broadcast %305 : vector<2x8x1xf32> to vector<2x8x8xf32>
    %307 = arith.mulf %302, %306 : vector<2x8x8xf32>
    %308 = arith.truncf %307 : vector<2x8x8xf32> to vector<2x8x8xbf16>
    "tpu.trace_start"() <{level = 10 : i32, message = "bqk,bkd->bqd"}> : () -> ()
    %cst_182 = arith.constant dense<0.000000e+00> : vector<2x8x16xf32>
    %309 = tpu.matmul %308, %292, %cst_182 {dimension_numbers = #tpu.dot_dimension_numbers<[2], [1], [1], [2], [0, 0, 0, 1, 1, 2], [0], [0]>} : vector<2x8x8xbf16>, vector<2x8x16xbf16>, vector<2x8x16xf32> -> vector<2x8x16xf32>
    "tpu.trace_stop"() : () -> ()
    %310 = vector.shape_cast %309 : vector<2x8x16xf32> to vector<16x16xf32>
    %311 = arith.truncf %310 : vector<16x16xf32> to vector<16x16xbf16>
    %c1_183 = arith.constant 1 : index
    %c0_184 = arith.constant 0 : index
    %c0_185 = arith.constant 0 : index
    %c0_186 = arith.constant 0 : index
    %312 = vector.load %arg13[%c1_183, %c0_184, %c0_185, %c0_186] : memref<2x2x16x32xbf16, #tpu.memory_space<vmem>>, vector<1x1x16x32xbf16>
    %313 = vector.shape_cast %312 : vector<1x1x16x32xbf16> to vector<16x32xbf16>
    %cst_187 = arith.constant dense<0.000000e+00> : vector<16x32xf32>
    %314 = tpu.matmul %311, %313, %cst_187 {dimension_numbers = #tpu.dot_dimension_numbers<[1], [0], [0], [1], [0, 0, 1, 1], [], []>} : vector<16x16xbf16>, vector<16x32xbf16>, vector<16x32xf32> -> vector<16x32xf32>
    %315 = arith.addf %265, %314 : vector<16x32xf32>
    %c1_188 = arith.constant 1 : index
    %c1_189 = arith.constant 1 : index
    %c0_190 = arith.constant 0 : index
    %c0_191 = arith.constant 0 : index
    %316 = vector.load %arg7[%c1_188, %c1_189, %c0_190, %c0_191] : memref<2x2x32x16xbf16, #tpu.memory_space<vmem>>, vector<1x1x32x16xbf16>
    %317 = vector.shape_cast %316 : vector<1x1x32x16xbf16> to vector<32x16xbf16>
    %cst_192 = arith.constant dense<0.000000e+00> : vector<16x16xf32>
    %318 = tpu.matmul %264, %317, %cst_192 {dimension_numbers = #tpu.dot_dimension_numbers<[1], [0], [0], [1], [0, 0, 1, 1], [], []>} : vector<16x32xbf16>, vector<32x16xbf16>, vector<16x16xf32> -> vector<16x16xf32>
    %c1_193 = arith.constant 1 : index
    %c1_194 = arith.constant 1 : index
    %c0_195 = arith.constant 0 : index
    %c0_196 = arith.constant 0 : index
    %319 = vector.load %arg8[%c1_193, %c1_194, %c0_195, %c0_196] : memref<2x2x1x16xf32, #tpu.memory_space<vmem>>, vector<1x1x1x16xf32>
    %320 = vector.shape_cast %319 : vector<1x1x1x16xf32> to vector<1x16xf32>
    %321 = vector.broadcast %320 : vector<1x16xf32> to vector<16x16xf32>
    %322 = arith.addf %318, %321 : vector<16x16xf32>
    %c1_197 = arith.constant 1 : index
    %c1_198 = arith.constant 1 : index
    %c0_199 = arith.constant 0 : index
    %c0_200 = arith.constant 0 : index
    %323 = vector.load %arg9[%c1_197, %c1_198, %c0_199, %c0_200] : memref<2x2x32x16xbf16, #tpu.memory_space<vmem>>, vector<1x1x32x16xbf16>
    %324 = vector.shape_cast %323 : vector<1x1x32x16xbf16> to vector<32x16xbf16>
    %cst_201 = arith.constant dense<0.000000e+00> : vector<16x16xf32>
    %325 = tpu.matmul %264, %324, %cst_201 {dimension_numbers = #tpu.dot_dimension_numbers<[1], [0], [0], [1], [0, 0, 1, 1], [], []>} : vector<16x32xbf16>, vector<32x16xbf16>, vector<16x16xf32> -> vector<16x16xf32>
    %c1_202 = arith.constant 1 : index
    %c1_203 = arith.constant 1 : index
    %c0_204 = arith.constant 0 : index
    %c0_205 = arith.constant 0 : index
    %326 = vector.load %arg10[%c1_202, %c1_203, %c0_204, %c0_205] : memref<2x2x1x16xf32, #tpu.memory_space<vmem>>, vector<1x1x1x16xf32>
    %327 = vector.shape_cast %326 : vector<1x1x1x16xf32> to vector<1x16xf32>
    %328 = vector.broadcast %327 : vector<1x16xf32> to vector<16x16xf32>
    %329 = arith.addf %325, %328 : vector<16x16xf32>
    %c1_206 = arith.constant 1 : index
    %c1_207 = arith.constant 1 : index
    %c0_208 = arith.constant 0 : index
    %c0_209 = arith.constant 0 : index
    %330 = vector.load %arg11[%c1_206, %c1_207, %c0_208, %c0_209] : memref<2x2x32x16xbf16, #tpu.memory_space<vmem>>, vector<1x1x32x16xbf16>
    %331 = vector.shape_cast %330 : vector<1x1x32x16xbf16> to vector<32x16xbf16>
    %cst_210 = arith.constant dense<0.000000e+00> : vector<16x16xf32>
    %332 = tpu.matmul %264, %331, %cst_210 {dimension_numbers = #tpu.dot_dimension_numbers<[1], [0], [0], [1], [0, 0, 1, 1], [], []>} : vector<16x32xbf16>, vector<32x16xbf16>, vector<16x16xf32> -> vector<16x16xf32>
    %c1_211 = arith.constant 1 : index
    %c1_212 = arith.constant 1 : index
    %c0_213 = arith.constant 0 : index
    %c0_214 = arith.constant 0 : index
    %333 = vector.load %arg12[%c1_211, %c1_212, %c0_213, %c0_214] : memref<2x2x1x16xf32, #tpu.memory_space<vmem>>, vector<1x1x1x16xf32>
    %334 = vector.shape_cast %333 : vector<1x1x1x16xf32> to vector<1x16xf32>
    %335 = vector.broadcast %334 : vector<1x16xf32> to vector<16x16xf32>
    %336 = arith.addf %332, %335 : vector<16x16xf32>
    %337 = vector.shape_cast %322 : vector<16x16xf32> to vector<2x8x16xf32>
    %338 = arith.truncf %337 : vector<2x8x16xf32> to vector<2x8x16xbf16>
    %339 = vector.shape_cast %329 : vector<16x16xf32> to vector<2x8x16xf32>
    %340 = arith.truncf %339 : vector<2x8x16xf32> to vector<2x8x16xbf16>
    %341 = vector.shape_cast %336 : vector<16x16xf32> to vector<2x8x16xf32>
    %342 = arith.truncf %341 : vector<2x8x16xf32> to vector<2x8x16xbf16>
    "tpu.trace_start"() <{level = 10 : i32, message = "bqd,bkd->bqk"}> : () -> ()
    %cst_215 = arith.constant dense<0.000000e+00> : vector<2x8x8xf32>
    %343 = tpu.matmul %338, %340, %cst_215 {dimension_numbers = #tpu.dot_dimension_numbers<[2], [2], [1], [1], [0, 0, 0, 1, 1, 1], [0], [0]>} : vector<2x8x16xbf16>, vector<2x8x16xbf16>, vector<2x8x8xf32> -> vector<2x8x8xf32>
    "tpu.trace_stop"() : () -> ()
    %cst_216 = arith.constant 2.500000e-01 : f32
    %344 = vector.broadcast %cst_216 : f32 to vector<2x8x8xf32>
    %345 = arith.mulf %343, %344 : vector<2x8x8xf32>
    %346 = vector.broadcast %47 : vector<2x1x8xf32> to vector<2x8x8xf32>
    %347 = arith.addf %345, %346 : vector<2x8x8xf32>
    %cst_217 = arith.constant dense<0xFF800000> : vector<2x8xf32>
    %348 = vector.multi_reduction <maximumf>, %347, %cst_217 [2] : vector<2x8x8xf32> to vector<2x8xf32>
    %349 = vector.shape_cast %348 : vector<2x8xf32> to vector<2x8x1xf32>
    %350 = vector.broadcast %349 : vector<2x8x1xf32> to vector<2x8x8xf32>
    %351 = arith.subf %347, %350 : vector<2x8x8xf32>
    %352 = math.exp %351 : vector<2x8x8xf32>
    %cst_218 = arith.constant dense<0.000000e+00> : vector<2x8xf32>
    %353 = vector.multi_reduction <add>, %352, %cst_218 [2] : vector<2x8x8xf32> to vector<2x8xf32>
    %354 = vector.shape_cast %353 : vector<2x8xf32> to vector<2x8x1xf32>
    %355 = tpu.reciprocal %354 {approx = true} : vector<2x8x1xf32> -> vector<2x8x1xf32>
    %356 = vector.broadcast %355 : vector<2x8x1xf32> to vector<2x8x8xf32>
    %357 = arith.mulf %352, %356 : vector<2x8x8xf32>
    %358 = arith.truncf %357 : vector<2x8x8xf32> to vector<2x8x8xbf16>
    "tpu.trace_start"() <{level = 10 : i32, message = "bqk,bkd->bqd"}> : () -> ()
    %cst_219 = arith.constant dense<0.000000e+00> : vector<2x8x16xf32>
    %359 = tpu.matmul %358, %342, %cst_219 {dimension_numbers = #tpu.dot_dimension_numbers<[2], [1], [1], [2], [0, 0, 0, 1, 1, 2], [0], [0]>} : vector<2x8x8xbf16>, vector<2x8x16xbf16>, vector<2x8x16xf32> -> vector<2x8x16xf32>
    "tpu.trace_stop"() : () -> ()
    %360 = vector.shape_cast %359 : vector<2x8x16xf32> to vector<16x16xf32>
    %361 = arith.truncf %360 : vector<16x16xf32> to vector<16x16xbf16>
    %c1_220 = arith.constant 1 : index
    %c1_221 = arith.constant 1 : index
    %c0_222 = arith.constant 0 : index
    %c0_223 = arith.constant 0 : index
    %362 = vector.load %arg13[%c1_220, %c1_221, %c0_222, %c0_223] : memref<2x2x16x32xbf16, #tpu.memory_space<vmem>>, vector<1x1x16x32xbf16>
    %363 = vector.shape_cast %362 : vector<1x1x16x32xbf16> to vector<16x32xbf16>
    %cst_224 = arith.constant dense<0.000000e+00> : vector<16x32xf32>
    %364 = tpu.matmul %361, %363, %cst_224 {dimension_numbers = #tpu.dot_dimension_numbers<[1], [0], [0], [1], [0, 0, 1, 1], [], []>} : vector<16x16xbf16>, vector<16x32xbf16>, vector<16x32xf32> -> vector<16x32xf32>
    %365 = arith.addf %315, %364 : vector<16x32xf32>
    %c1_225 = arith.constant 1 : index
    %c0_226 = arith.constant 0 : index
    %c0_227 = arith.constant 0 : index
    %366 = vector.load %arg14[%c1_225, %c0_226, %c0_227] : memref<2x1x32xf32, #tpu.memory_space<vmem>>, vector<1x1x32xf32>
    %367 = vector.shape_cast %366 : vector<1x1x32xf32> to vector<1x32xf32>
    %368 = vector.broadcast %367 : vector<1x32xf32> to vector<16x32xf32>
    %369 = arith.addf %365, %368 : vector<16x32xf32>
    %370 = arith.addf %263, %369 : vector<16x32xf32>
    %c1_228 = arith.constant 1 : index
    %c0_229 = arith.constant 0 : index
    %c0_230 = arith.constant 0 : index
    %371 = vector.load %arg15[%c1_228, %c0_229, %c0_230] : memref<2x1x32xf32, #tpu.memory_space<vmem>>, vector<1x1x32xf32>
    %372 = vector.shape_cast %371 : vector<1x1x32xf32> to vector<1x32xf32>
    %c1_231 = arith.constant 1 : index
    %c0_232 = arith.constant 0 : index
    %c0_233 = arith.constant 0 : index
    %373 = vector.load %arg16[%c1_231, %c0_232, %c0_233] : memref<2x1x32xf32, #tpu.memory_space<vmem>>, vector<1x1x32xf32>
    %374 = vector.shape_cast %373 : vector<1x1x32xf32> to vector<1x32xf32>
    %cst_234 = arith.constant dense<0.000000e+00> : vector<16xf32>
    %375 = vector.multi_reduction <add>, %370, %cst_234 [1] : vector<16x32xf32> to vector<16xf32>
    %376 = vector.shape_cast %375 : vector<16xf32> to vector<16x1xf32>
    %cst_235 = arith.constant 3.200000e+01 : f32
    %377 = vector.broadcast %cst_235 : f32 to vector<16x1xf32>
    %378 = arith.divf %376, %377 : vector<16x1xf32>
    %379 = vector.broadcast %378 : vector<16x1xf32> to vector<16x32xf32>
    %380 = arith.subf %370, %379 : vector<16x32xf32>
    %381 = arith.mulf %380, %380 : vector<16x32xf32>
    %cst_236 = arith.constant dense<0.000000e+00> : vector<16xf32>
    %382 = vector.multi_reduction <add>, %381, %cst_236 [1] : vector<16x32xf32> to vector<16xf32>
    %383 = vector.shape_cast %382 : vector<16xf32> to vector<16x1xf32>
    %cst_237 = arith.constant 3.200000e+01 : f32
    %384 = vector.broadcast %cst_237 : f32 to vector<16x1xf32>
    %385 = arith.divf %383, %384 : vector<16x1xf32>
    %386 = vector.broadcast %378 : vector<16x1xf32> to vector<16x32xf32>
    %387 = arith.subf %370, %386 : vector<16x32xf32>
    %cst_238 = arith.constant 9.99999996E-13 : f32
    %388 = vector.broadcast %cst_238 : f32 to vector<16x1xf32>
    %389 = arith.addf %385, %388 : vector<16x1xf32>
    %390 = math.rsqrt %389 : vector<16x1xf32>
    %391 = vector.broadcast %390 : vector<16x1xf32> to vector<16x32xf32>
    %392 = arith.mulf %387, %391 : vector<16x32xf32>
    %393 = vector.broadcast %372 : vector<1x32xf32> to vector<16x32xf32>
    %394 = arith.mulf %392, %393 : vector<16x32xf32>
    %395 = vector.broadcast %374 : vector<1x32xf32> to vector<16x32xf32>
    %396 = arith.addf %394, %395 : vector<16x32xf32>
    %397 = arith.truncf %396 : vector<16x32xf32> to vector<16x32xbf16>
    %c1_239 = arith.constant 1 : index
    %c0_240 = arith.constant 0 : index
    %c0_241 = arith.constant 0 : index
    %398 = vector.load %arg17[%c1_239, %c0_240, %c0_241] : memref<2x32x64xbf16, #tpu.memory_space<vmem>>, vector<1x32x64xbf16>
    %399 = vector.shape_cast %398 : vector<1x32x64xbf16> to vector<32x64xbf16>
    %cst_242 = arith.constant dense<0.000000e+00> : vector<16x64xf32>
    %400 = tpu.matmul %397, %399, %cst_242 {dimension_numbers = #tpu.dot_dimension_numbers<[1], [0], [0], [1], [0, 0, 1, 1], [], []>} : vector<16x32xbf16>, vector<32x64xbf16>, vector<16x64xf32> -> vector<16x64xf32>
    %c1_243 = arith.constant 1 : index
    %c0_244 = arith.constant 0 : index
    %c0_245 = arith.constant 0 : index
    %401 = vector.load %arg18[%c1_243, %c0_244, %c0_245] : memref<2x1x64xf32, #tpu.memory_space<vmem>>, vector<1x1x64xf32>
    %402 = vector.shape_cast %401 : vector<1x1x64xf32> to vector<1x64xf32>
    %403 = vector.broadcast %402 : vector<1x64xf32> to vector<16x64xf32>
    %404 = arith.addf %400, %403 : vector<16x64xf32>
    %cst_246 = arith.constant 5.000000e-01 : f32
    %405 = vector.broadcast %cst_246 : f32 to vector<16x64xf32>
    %406 = arith.mulf %405, %404 : vector<16x64xf32>
    %cst_247 = arith.constant 0.707106769 : f32
    %407 = vector.broadcast %cst_247 : f32 to vector<16x64xf32>
    %408 = arith.mulf %404, %407 : vector<16x64xf32>
    %409 = math.absf %408 : vector<16x64xf32>
    %cst_248 = arith.constant 0.327591091 : f32
    %410 = vector.broadcast %cst_248 : f32 to vector<16x64xf32>
    %411 = arith.mulf %410, %409 : vector<16x64xf32>
    %cst_249 = arith.constant 1.000000e+00 : f32
    %412 = vector.broadcast %cst_249 : f32 to vector<16x64xf32>
    %413 = arith.addf %412, %411 : vector<16x64xf32>
    %cst_250 = arith.constant 1.000000e+00 : f32
    %414 = vector.broadcast %cst_250 : f32 to vector<16x64xf32>
    %415 = arith.divf %414, %413 : vector<16x64xf32>
    %cst_251 = arith.constant 1.06140542 : f32
    %416 = vector.broadcast %cst_251 : f32 to vector<16x64xf32>
    %417 = arith.mulf %416, %415 : vector<16x64xf32>
    %cst_252 = arith.constant -1.45315206 : f32
    %418 = vector.broadcast %cst_252 : f32 to vector<16x64xf32>
    %419 = arith.addf %417, %418 : vector<16x64xf32>
    %420 = arith.mulf %419, %415 : vector<16x64xf32>
    %cst_253 = arith.constant 1.42141378 : f32
    %421 = vector.broadcast %cst_253 : f32 to vector<16x64xf32>
    %422 = arith.addf %420, %421 : vector<16x64xf32>
    %423 = arith.mulf %422, %415 : vector<16x64xf32>
    %cst_254 = arith.constant -0.284496725 : f32
    %424 = vector.broadcast %cst_254 : f32 to vector<16x64xf32>
    %425 = arith.addf %423, %424 : vector<16x64xf32>
    %426 = arith.mulf %425, %415 : vector<16x64xf32>
    %cst_255 = arith.constant 0.254829586 : f32
    %427 = vector.broadcast %cst_255 : f32 to vector<16x64xf32>
    %428 = arith.addf %426, %427 : vector<16x64xf32>
    %429 = arith.mulf %428, %415 : vector<16x64xf32>
    %cst_256 = arith.constant 0.000000e+00 : f32
    %430 = vector.broadcast %cst_256 : f32 to vector<16x64xf32>
    %431 = arith.subf %430, %409 : vector<16x64xf32>
    %432 = arith.mulf %431, %409 : vector<16x64xf32>
    %433 = math.exp %432 : vector<16x64xf32>
    %434 = arith.mulf %429, %433 : vector<16x64xf32>
    %cst_257 = arith.constant 1.000000e+00 : f32
    %435 = vector.broadcast %cst_257 : f32 to vector<16x64xf32>
    %436 = arith.subf %435, %434 : vector<16x64xf32>
    %cst_258 = arith.constant 0.000000e+00 : f32
    %437 = vector.broadcast %cst_258 : f32 to vector<16x64xf32>
    %438 = arith.cmpf oge, %408, %437 : vector<16x64xf32>
    %cst_259 = arith.constant 0.000000e+00 : f32
    %439 = vector.broadcast %cst_259 : f32 to vector<16x64xf32>
    %440 = arith.subf %439, %436 : vector<16x64xf32>
    %441 = arith.select %438, %436, %440 : vector<16x64xi1>, vector<16x64xf32>
    %cst_260 = arith.constant 1.000000e+00 : f32
    %442 = vector.broadcast %cst_260 : f32 to vector<16x64xf32>
    %443 = arith.addf %442, %441 : vector<16x64xf32>
    %444 = arith.mulf %406, %443 : vector<16x64xf32>
    %445 = arith.truncf %444 : vector<16x64xf32> to vector<16x64xbf16>
    %c1_261 = arith.constant 1 : index
    %c0_262 = arith.constant 0 : index
    %c0_263 = arith.constant 0 : index
    %446 = vector.load %arg19[%c1_261, %c0_262, %c0_263] : memref<2x64x32xbf16, #tpu.memory_space<vmem>>, vector<1x64x32xbf16>
    %447 = vector.shape_cast %446 : vector<1x64x32xbf16> to vector<64x32xbf16>
    %cst_264 = arith.constant dense<0.000000e+00> : vector<16x32xf32>
    %448 = tpu.matmul %445, %447, %cst_264 {dimension_numbers = #tpu.dot_dimension_numbers<[1], [0], [0], [1], [0, 0, 1, 1], [], []>} : vector<16x64xbf16>, vector<64x32xbf16>, vector<16x32xf32> -> vector<16x32xf32>
    %c1_265 = arith.constant 1 : index
    %c0_266 = arith.constant 0 : index
    %c0_267 = arith.constant 0 : index
    %449 = vector.load %arg20[%c1_265, %c0_266, %c0_267] : memref<2x1x32xf32, #tpu.memory_space<vmem>>, vector<1x1x32xf32>
    %450 = vector.shape_cast %449 : vector<1x1x32xf32> to vector<1x32xf32>
    %451 = vector.broadcast %450 : vector<1x32xf32> to vector<16x32xf32>
    %452 = arith.addf %448, %451 : vector<16x32xf32>
    %453 = arith.addf %396, %452 : vector<16x32xf32>
    %c1_268 = arith.constant 1 : index
    %c0_269 = arith.constant 0 : index
    %c0_270 = arith.constant 0 : index
    %454 = vector.load %arg21[%c1_268, %c0_269, %c0_270] : memref<2x1x32xf32, #tpu.memory_space<vmem>>, vector<1x1x32xf32>
    %455 = vector.shape_cast %454 : vector<1x1x32xf32> to vector<1x32xf32>
    %c1_271 = arith.constant 1 : index
    %c0_272 = arith.constant 0 : index
    %c0_273 = arith.constant 0 : index
    %456 = vector.load %arg22[%c1_271, %c0_272, %c0_273] : memref<2x1x32xf32, #tpu.memory_space<vmem>>, vector<1x1x32xf32>
    %457 = vector.shape_cast %456 : vector<1x1x32xf32> to vector<1x32xf32>
    %cst_274 = arith.constant dense<0.000000e+00> : vector<16xf32>
    %458 = vector.multi_reduction <add>, %453, %cst_274 [1] : vector<16x32xf32> to vector<16xf32>
    %459 = vector.shape_cast %458 : vector<16xf32> to vector<16x1xf32>
    %cst_275 = arith.constant 3.200000e+01 : f32
    %460 = vector.broadcast %cst_275 : f32 to vector<16x1xf32>
    %461 = arith.divf %459, %460 : vector<16x1xf32>
    %462 = vector.broadcast %461 : vector<16x1xf32> to vector<16x32xf32>
    %463 = arith.subf %453, %462 : vector<16x32xf32>
    %464 = arith.mulf %463, %463 : vector<16x32xf32>
    %cst_276 = arith.constant dense<0.000000e+00> : vector<16xf32>
    %465 = vector.multi_reduction <add>, %464, %cst_276 [1] : vector<16x32xf32> to vector<16xf32>
    %466 = vector.shape_cast %465 : vector<16xf32> to vector<16x1xf32>
    %cst_277 = arith.constant 3.200000e+01 : f32
    %467 = vector.broadcast %cst_277 : f32 to vector<16x1xf32>
    %468 = arith.divf %466, %467 : vector<16x1xf32>
    %469 = vector.broadcast %461 : vector<16x1xf32> to vector<16x32xf32>
    %470 = arith.subf %453, %469 : vector<16x32xf32>
    %cst_278 = arith.constant 9.99999996E-13 : f32
    %471 = vector.broadcast %cst_278 : f32 to vector<16x1xf32>
    %472 = arith.addf %468, %471 : vector<16x1xf32>
    %473 = math.rsqrt %472 : vector<16x1xf32>
    %474 = vector.broadcast %473 : vector<16x1xf32> to vector<16x32xf32>
    %475 = arith.mulf %470, %474 : vector<16x32xf32>
    %476 = vector.broadcast %455 : vector<1x32xf32> to vector<16x32xf32>
    %477 = arith.mulf %475, %476 : vector<16x32xf32>
    %478 = vector.broadcast %457 : vector<1x32xf32> to vector<16x32xf32>
    %479 = arith.addf %477, %478 : vector<16x32xf32>
    %480 = vector.shape_cast %479 : vector<16x32xf32> to vector<2x8x32xf32>
    %481 = vector.extract_strided_slice %480 {offsets = [0, 0, 0], sizes = [2, 1, 32], strides = [1, 1, 1]} : vector<2x8x32xf32> to vector<2x1x32xf32>
    %482 = vector.shape_cast %481 : vector<2x1x32xf32> to vector<2x32xf32>
    %483 = arith.truncf %482 : vector<2x32xf32> to vector<2x32xbf16>
    %c0_279 = arith.constant 0 : index
    %c0_280 = arith.constant 0 : index
    %484 = vector.load %arg23[%c0_279, %c0_280] : memref<32x32xbf16, #tpu.memory_space<vmem>>, vector<32x32xbf16>
    %cst_281 = arith.constant dense<0.000000e+00> : vector<2x32xf32>
    %485 = tpu.matmul %483, %484, %cst_281 {dimension_numbers = #tpu.dot_dimension_numbers<[1], [0], [0], [1], [0, 0, 1, 1], [], []>} : vector<2x32xbf16>, vector<32x32xbf16>, vector<2x32xf32> -> vector<2x32xf32>
    %c0_282 = arith.constant 0 : index
    %c0_283 = arith.constant 0 : index
    %486 = vector.load %arg24[%c0_282, %c0_283] : memref<1x32xf32, #tpu.memory_space<vmem>>, vector<1x32xf32>
    %487 = vector.broadcast %486 : vector<1x32xf32> to vector<2x32xf32>
    %488 = arith.addf %485, %487 : vector<2x32xf32>
    %cst_284 = arith.constant 0.000000e+00 : f32
    %489 = vector.broadcast %cst_284 : f32 to vector<2x32xf32>
    %490 = arith.maximumf %488, %489 : vector<2x32xf32>
    %491 = arith.truncf %490 : vector<2x32xf32> to vector<2x32xbf16>
    %c0_285 = arith.constant 0 : index
    %c0_286 = arith.constant 0 : index
    %492 = vector.load %arg25[%c0_285, %c0_286] : memref<32x128xbf16, #tpu.memory_space<vmem>>, vector<32x128xbf16>
    %cst_287 = arith.constant dense<0.000000e+00> : vector<2x128xf32>
    %493 = tpu.matmul %491, %492, %cst_287 {dimension_numbers = #tpu.dot_dimension_numbers<[1], [0], [0], [1], [0, 0, 1, 1], [], []>} : vector<2x32xbf16>, vector<32x128xbf16>, vector<2x128xf32> -> vector<2x128xf32>
    %c0_288 = arith.constant 0 : index
    %c0_289 = arith.constant 0 : index
    %494 = vector.load %arg26[%c0_288, %c0_289] : memref<1x128xf32, #tpu.memory_space<vmem>>, vector<1x128xf32>
    %495 = vector.broadcast %494 : vector<1x128xf32> to vector<2x128xf32>
    %496 = arith.addf %493, %495 : vector<2x128xf32>
    %c0_290 = arith.constant 0 : index
    %c0_291 = arith.constant 0 : index
    %497 = vector.load %arg27[%c0_290, %c0_291] : memref<2x128xf32, #tpu.memory_space<vmem>>, vector<2x128xf32>
    tpu.vector_store %arg27[%c0_290, %c0_291], %496 {strides = array<i32>} : memref<2x128xf32, #tpu.memory_space<vmem>>, vector<2x128xf32>,
    return
  }
}

</mosaic_0001>

<bundles_post_ra>
// kernel: bert_for_da_forward.1
= control target key start
LH: loop header
LB: loop body
LE: loop exit
PB: predicated region body
PF: predicated region fallthrough
CT: control target
= control target key end

     0   :  { %s4419_s0 = inlined_call_operand.vmem [shape: s32[16,1], index: 0, kind: input, shape index: {}]   ;;  %s4420_s1 = inlined_call_operand.vmem [shape: f32[2,8], index: 1, kind: input, shape index: {}]   ;;  %s4421_s2 = inlined_call_operand.vmem [shape: f32[64,32], index: 2, kind: input, shape index: {}]   ;;  %s4422_s3 = inlined_call_operand.vmem [shape: f32[16,32], index: 3, kind: input, shape index: {}]   ;;  %s4423_s4 = inlined_call_operand.vmem [shape: f32[2,32], index: 4, kind: input, shape index: {}]   ;;  %s4424_s5 = inlined_call_operand.vmem [shape: f32[1,32], index: 5, kind: input, shape index: {}]   ;;  %s4425_s6 = inlined_call_operand.vmem [shape: f32[1,32], index: 6, kind: input, shape index: {}]   ;;  %s4426_s7 = inlined_call_operand.vmem [shape: bf16[2,2,32,16], index: 7, kind: input, shape index: {}]   ;;  %s4427_s8 = inlined_call_operand.vmem [shape: f32[2,2,1,16], index: 8, kind: input, shape index: {}]   ;;  %s4428_s9 = inlined_call_operand.vmem [shape: bf16[2,2,32,16], index: 9, kind: input, shape index: {}]   ;;  %s4429_s10 = inlined_call_operand.vmem [shape: f32[2,2,1,16], index: 10, kind: input, shape index: {}]   ;;  %s4430_s11 = inlined_call_operand.vmem [shape: bf16[2,2,32,16], index: 11, kind: input, shape index: {}]   ;;  %s4431_s12 = inlined_call_operand.vmem [shape: f32[2,2,1,16], index: 12, kind: input, shape index: {}]   ;;  %s4432_s13 = inlined_call_operand.vmem [shape: bf16[2,2,16,32], index: 13, kind: input, shape index: {}]   ;;  %s4433_s14 = inlined_call_operand.vmem [shape: f32[2,1,32], index: 14, kind: input, shape index: {}]   ;;  %s4434_s15 = inlined_call_operand.vmem [shape: f32[2,1,32], index: 15, kind: input, shape index: {}]   ;;  %s4435_s16 = inlined_call_operand.vmem [shape: f32[2,1,32], index: 16, kind: input, shape index: {}]   ;;  %s4436_s17 = inlined_call_operand.vmem [shape: bf16[2,32,64], index: 17, kind: input, shape index: {}]   ;;  %s4437_s18 = inlined_call_operand.vmem [shape: f32[2,1,64], index: 18, kind: input, shape index: {}]   ;;  %s4438_s19 = inlined_call_operand.vmem [shape: bf16[2,64,32], index: 19, kind: input, shape index: {}]   ;;  %s4439_s20 = inlined_call_operand.vmem [shape: f32[2,1,32], index: 20, kind: input, shape index: {}]   ;;  %s4440_s21 = inlined_call_operand.vmem [shape: f32[2,1,32], index: 21, kind: input, shape index: {}]   ;;  %s4441_s22 = inlined_call_operand.vmem [shape: f32[2,1,32], index: 22, kind: input, shape index: {}]   ;;  %s4442_s23 = inlined_call_operand.vmem [shape: bf16[32,32], index: 23, kind: input, shape index: {}]   ;;  %s4443_s24 = inlined_call_operand.vmem [shape: f32[1,32], index: 24, kind: input, shape index: {}]   ;;  %s4444_s25 = inlined_call_operand.vmem [shape: bf16[32,128], index: 25, kind: input, shape index: {}]   ;;  %s4445_s26 = inlined_call_operand.vmem [shape: f32[1,128], index: 26, kind: input, shape index: {}]   ;;  %s4446_s27 = inlined_call_operand.hbm [shape: f32[2,128], index: 27, kind: output, shape index: {}]  }
   0x1   :  { %4455 = sst [smem:[#allocation5_spill]] %s4419_s0 }
   0x2   :  { %4456 = sst [smem:[#allocation6_spill]] %s4420_s1 }
   0x3   :  { %4457 = sst [smem:[#allocation7_spill]] %s4421_s2 }
   0x4   :  { %4458 = sst [smem:[#allocation8_spill]] %s4422_s3 }
   0x5   :  { %4459 = sst [smem:[#allocation9_spill]] %s4423_s4 }
   0x6   :  { %4460 = sst [smem:[#allocation10_spill]] %s4424_s5 }
   0x7   :  { %4461 = sst [smem:[#allocation11_spill]] %s4425_s6 }
   0x8   :  { %4462 = sst [smem:[#allocation12_spill]] %s4426_s7 }
   0x9   :  { %4463 = sst [smem:[#allocation13_spill]] %s4427_s8 }
   0xa   :  { %4464 = sst [smem:[#allocation14_spill]] %s4428_s9 }
   0xb   :  { %4465 = sst [smem:[#allocation15_spill]] %s4429_s10 }
   0xc   :  { %4466 = sst [smem:[#allocation16_spill]] %s4430_s11 }
   0xd   :  { %4467 = sst [smem:[#allocation17_spill]] %s4441_s22 }
   0xe   :  { %s4468_s8 = sld [smem:[#allocation5_spill]]  ;;  %s4469_s22 = sld [smem:[#allocation7_spill]]  ;;  %v3691_v2 = vmov 0   ;;  %v3692_v11 = vmov 0.0  }
   0xf   :  { %3554 = vset.pattern.permute.xlu0 %v3691_v2  ;;  %3261 = vmatprep.subr.bf16.mxu1 %v3692_v11 }
  0x14   :  { %v88_v0 = vld [vmem:[%s4468_s8] sm:$0xff]  ;;  %v103_v3 = vld [vmem:[%s4469_s22 + $0x8] sm:$0xff]  ;;  %v104_v4 = vld [vmem:[%s4469_s22 + $0x10] sm:$0xff] }
  0x15   :  { %v102_v1 = vld [vmem:[%s4469_s22] sm:$0xff]  ;;  %v105_v5 = vld [vmem:[%s4469_s22 + $0x18] sm:$0xff]  ;;  %93 = vperm.xlu0 %3554, %v88_v0   ;;  %v89_v6 = vld [vmem:[%s4468_s8 + $0x8] sm:$0xff] }
  0x16   :  { %v3533_v7 = vpack.c.bf16 %v103_v3, %v102_v1  ;;  %v3537_v8 = vpack.c.bf16 %v105_v5, %v104_v4  ;;  %v106_v9 = vld [vmem:[%s4469_s22 + $0x20] sm:$0xff]  ;;  %v107_v10 = vld [vmem:[%s4469_s22 + $0x28] sm:$0xff]  ;;  %v108_v12 = vld [vmem:[%s4469_s22 + $0x30] sm:$0xff] }
  0x17   :  { %v109_v13 = vld [vmem:[%s4469_s22 + $0x38] sm:$0xff]  ;;  %v3541_v14 = vpack.c.bf16 %v107_v10, %v106_v9 }
  0x18   :  { %3534 = vmatprep.subr.bf16.mxu0 %v3533_v7  ;;  %v3545_v15 = vpack.c.bf16 %v109_v13, %v108_v12 }
  0x19   :  { %3536 = vmatpush3.bf16.msra.mxu0 %v3533_v7  ;;  %96 = vperm.xlu0 %3554, %v89_v6  }
  0x1a   :  { %3538 = vmatprep.subr.bf16.mxu0 %v3537_v8 }
  0x1d   :  { %3540 = vmatpush3.bf16.msra.mxu0 %v3537_v8 }
  0x1e   :  { %3542 = vmatprep.subr.bf16.mxu0 %v3541_v14 }
  0x21   :  { %3544 = vmatpush3.bf16.msra.mxu0 %v3541_v14 }
  0x22   :  { %3546 = vmatprep.subr.bf16.mxu0 %v3545_v15 }
  0x25   :  { %3548 = vmatpush3.bf16.msra.mxu0 %v3545_v15 }
  0x26   :  { %3277 = vmatprep.subr.bf16.mxu0 %v3692_v11 }
  0x27   :  { %32 = vsyncpa [#allocation3], 0  ;;  %v90_v16 = vlaneseq  ;;  %vm110_vm0 = vcmask 523264   ;;  %s4470_s0 = sld [smem:[#allocation8_spill]]  ;;  %s4471_s1 = sld [smem:[#allocation9_spill]]  ;;  %vm203_vm3 = vcmask 261120  }
  0x28   :  { %s4472_s2 = sld [smem:[#allocation12_spill]]  ;;  %s4473_s4 = sld [smem:[#allocation16_spill]]  ;;  %vm3693_vm4 = vmmov 0   ;;  %v2962_v13 = vld [vmem:[%s4431_s12] ss:$0 sm:$0xff]  ;;  %vm475_vm5 = vcmask 130048  }
  0x29   :  { %v91_v17 = vand.u32 127, %v90_v16  ;;  %3265 = vmatprep.mubr.msk.bf16.mxu1 %vm3693_vm4, %v3692_v11  ;;  %s4476_s3 = sld [smem:[#allocation14_spill]]  ;;  %s4477_s5 = sld [smem:[#allocation15_spill]]  ;;  %vm610_vm6 = vcmask 1043456   ;;  %vm582_vm7 = vcmask 64512   ;;  %vm2808_vm12 = vcmask 1041409  }
  0x2a   :  { %s4478_s29 = sld [smem:[#allocation13_spill]]  ;;  %s4479_s11 = sld [smem:[#allocation6_spill]] }
  0x2b   :  { %s4480_s30 = sld [smem:[#allocation17_spill]]  ;;  %s3695_s9 = smov [#allocation2]  }
  0x2d   :  { %v192_v22 = vld [vmem:[%s4470_s0] sm:$0xff]  ;;  %s4474_s0 = sld [smem:[#allocation10_spill]] }
  0x2e   :  { %v2951_v23 = vld [vmem:[%s4471_s1] ss:$0 sm:$0xff]  ;;  %v3557_v43 = vld [vmem:[%s4472_s2 + $0x8] sm:$0xff]   ;;  %s4475_s1 = sld [smem:[#allocation11_spill]] }
  0x2f   :  { %v198_v24 = vadd.f32 %v2951_v23, %v192_v22  ;;  %v3555_v41 = vld [vmem:[%s4472_s2] sm:$0xff]   ;;  %v3558_v44 = vld [vmem:[%s4473_s4 + $0x8] sm:$0xff]  }
  0x30   :  { %v3556_v42 = vld [vmem:[%s4473_s4] sm:$0xff]   ;;  %3262 = vmatpush3.bf16.msra.mxu1 %v3555_v41  ;;  %v3560_v63 = vld [vmem:[%s4476_s3 + $0x8] sm:$0xff]  }
  0x31   :  { %3263 = vmatprep.subr.bf16.mxu1 %v3692_v11  ;;  %v3559_v61 = vld [vmem:[%s4476_s3] sm:$0xff]  }
  0x32   :  { %v2958_v8 = vld [vmem:[%s4477_s5] ss:$0 sm:$0xff] }
  0x33   :  { %v2952_v53 = vld [vmem:[%s4474_s0] ss:$0 sm:$0xff] }
  0x34   :  { %3264 = vmatpush3.bf16.msra.mxu1 %v3557_v43  ;;  %v2953_v57 = vld [vmem:[%s4475_s1] ss:$0 sm:$0xff] }
  0x35   :  { %3269 = vmatprep.subr.bf16.mxu1 %v3692_v11 }
  0x94   :  { %v94_v18 = vpop.permute.xlu0 %93 }
  0x95   :  { %vm98_vm1 = vcmp.eq.s32.totalorder %v91_v17, %v94_v18 }
  0x96   :  { %v100_v19 = vsel %vm98_vm1, 1.0, %v3692_v11 }
  0x97   :  { %3258 = vmatprep.mubr.msk.f32.mxu0 %vm110_vm0, %v100_v19  ;;  %v2954_v19 = vld [vmem:[%s4478_s29] ss:$0 sm:$0xff] }
  0x98   :  { %v97_v20 = vpop.permute.xlu0 %96 }
  0x99   :  { %vm99_vm2 = vcmp.eq.s32.totalorder %v91_v17, %v97_v20 }
  0x9a   :  { %v101_v21 = vsel %vm99_vm2, 1.0, %v3692_v11 }
  0x9b   :  { %3259 = vmatmul.mubr.msk.f32.vlgmr.msra.gmra.mrb[0].mxu0 %vm110_vm0, %v101_v21 }
  0x9c   :  { %3278 = vmatpush3.bf16.msra.mxu0 %v3556_v42  ;;  %3281 = vmatprep.mubr.msk.bf16.mxu0 %vm3693_vm4, %v3692_v11 }
  0x9d   :  { %3279 = vmatprep.subr.bf16.mxu0 %v3692_v11 }
  0xa0   :  { %3280 = vmatpush3.bf16.msra.mxu0 %v3558_v44 }
  0xa1   :  { %3291 = vmatprep.subr.bf16.mxu0 %v3692_v11 }
 0x16e   :  { %v3260_v25 = vpop.f32.mrb[0].mxu0 }
 0x16f   :  { %v183_v26 = vpop.f32.mrb[1].mxu0  ;;  %v200_v28 = vadd.f32 %v3260_v25, %v198_v24 }
 0x170   :  { %v199_v27 = vadd.f32 %v198_v24, %v183_v26 }
 0x171   :  { %v207_v30 = vsel %vm203_vm3, %v200_v28, 0.0 }
 0x172   :  { %v204_v29 = vsel %vm203_vm3, %v199_v27, 0.0 }
 0x173   :  { %205 = vadd.xlane.f32.xlu1 %v204_v29 }
 0x177   :  { %208 = vadd.xlane.f32.xlu1 %v207_v30 }
 0x200   :  { %v206_v31 = vpop.xlane.xlu1 %205 }
 0x201   :  { %v211_v32 = vmul.f32 0.03125, %v206_v31 }
 0x203   :  { %v213_v33 = vsub.f32 %v199_v27, %v211_v32 }
 0x204   :  { %v209_v34 = vpop.xlane.xlu1 %208 }
 0x205   :  { %v212_v35 = vmul.f32 0.03125, %v209_v34  ;;  %v215_v36 = vmul.f32 %v213_v33, %v213_v33 }
 0x207   :  { %v214_v37 = vsub.f32 %v200_v28, %v212_v35  ;;  %v217_v38 = vsel %vm203_vm3, %v215_v36, 0.0  ;;  %v247_v35 = vld [vmem:[%s4479_s11] sm:$0x3] }
 0x208   :  { %218 = vadd.xlane.f32.xlu0 %v217_v38  ;;  %v248_v36 = vsub.f32 1.0, %v247_v35  ;;  %v255_v38 = vshrl.u32 %v90_v16, 7 }
 0x209   :  { %v216_v39 = vmul.f32 %v214_v37, %v214_v37 }
 0x20a   :  { %v572_v44 = vsub.s32 0, %v255_v38 }
 0x20b   :  { %v220_v40 = vsel %vm203_vm3, %v216_v39, 0.0  ;;  %v249_v39 = vmul.f32 -10000.0, %v248_v36 }
 0x20c   :  { %221 = vadd.xlane.f32.xlu1 %v220_v40 }
 0x295   :  { %v219_v45 = vpop.xlane.xlu0 %218 }
 0x296   :  { %v223_v46 = vmul.f32 0.03125, %v219_v45 }
 0x298   :  { %v225_v47 = vadd.f32 1e-12, %v223_v46 }
 0x299   :  { %v222_v48 = vpop.xlane.xlu1 %221 }
 0x29a   :  { %3599 = vrsqrt.f32 %v225_v47  ;;  %v224_v49 = vmul.f32 0.03125, %v222_v48 }
 0x29c   :  { %v226_v50 = vadd.f32 1e-12, %v224_v49 }
 0x29e   :  { %3601 = vrsqrt.f32 %v226_v50 }
 0x2a4   :  { %v3600_v51 = vpop.eup %3599 }
 0x2a5   :  { %v229_v52 = vmul.f32 %v3600_v51, %v213_v33  ;;  %v3694_v33 = vmov 1966171168  }
 0x2a6   :  { %v252_v34 = vunpack.c.l.s4 %v3694_v33 }
 0x2a7   :  { %v237_v55 = vmul.f32 %v2952_v53, %v229_v52 }
 0x2a8   :  { %v3602_v54 = vpop.eup %3601 }
 0x2a9   :  { %v230_v56 = vmul.f32 %v3602_v54, %v214_v37  ;;  %v3909_v59 = vadd.f32 %v2953_v57, %v237_v55  ;;  %v253_v37 = vunpack.c.0.s8 %v252_v34  ;;  %v2984_v34 = vld [vmem:[%s4477_s5 + $0x1] ss:$0 sm:$0xff] }
 0x2ab   :  { %v238_v58 = vmul.f32 %v2952_v53, %v230_v56  ;;  %v256_v40 = vsub.s32 %v253_v37, %v255_v38 }
 0x2ad   :  { %v3911_v60 = vadd.f32 %v2953_v57, %v238_v58  ;;  %v257_v41 = vrot.slane %v249_v39, %v256_v40 }
 0x2af   :  { %v3918_v62 = vpack.c.bf16 %v3911_v60, %v3909_v59  ;;  %v258_v42 = vcombine.high %v257_v41, %v257_v41  ;;  %v265_v45 = vrot.slane %v257_v41, %v256_v40 }
 0x2b1   :  { %3266 = vmatmul.mubr.msk.bf16.vlgmr.msra.gmra.mrb[0].mxu1 %vm203_vm3, %v3918_v62  ;;  %3282 = vmatmul.mubr.msk.bf16.vlgmr.msra.gmra.mrb[4].mxu0 %vm203_vm3, %v3918_v62  ;;  %v272_v43 = vrot.slane %v258_v42, %v256_v40  ;;  %v3966_v55 = vrot.slane %v265_v45, %v572_v44  ;;  %v2975_v42 = vld [vmem:[%s4478_s29 + $0x1] ss:$0 sm:$0xff] }
 0x2b2   :  { %3270 = vmatpush3.bf16.msra.mxu1 %v3559_v61  ;;  %3273 = vmatprep.mubr.msk.bf16.mxu1 %vm3693_vm4, %v3692_v11 }
 0x2b3   :  { %3271 = vmatprep.subr.bf16.mxu1 %v3692_v11  ;;  %3293 = vmatprep.mubr.msk.bf16.mxu0 %vm3693_vm4, %v3692_v11  ;;  %v3964_v48 = vrot.slane %v272_v43, %v572_v44 }
 0x2b6   :  { %3272 = vmatpush3.bf16.msra.mxu1 %v3560_v63 }
 0x2b7   :  { %3285 = vmatprep.subr.bf16.mxu1 %v3692_v11 }
 0x2b9   :  { %3274 = vmatmul.mubr.msk.bf16.vlgmr.msra.gmra.mrb[4].mxu1 %vm203_vm3, %v3918_v62 }
 0x2ba   :  { %3287 = vmatprep.mubr.msk.bf16.mxu1 %vm3693_vm4, %v3692_v11 }
 0x384   :  { %v334_v0 = vpop.f32.mrb[0].mxu1  ;;  %v462_v1 = vpop.f32.mrb[4].mxu0 }
 0x385   :  { %v3267_v2 = vpop.f32.mrb[1].mxu1  ;;  %v3283_v3 = vpop.f32.mrb[5].mxu0  ;;  %v463_v20 = vadd.f32 %v2962_v13, %v462_v1  ;;  %v335_v23 = vadd.f32 %v2954_v19, %v334_v0 }
 0x386   :  { %v337_v4 = vpop.f32.mrb[2].mxu1  ;;  %v465_v5 = vpop.f32.mrb[6].mxu0 }
 0x387   :  { %v3268_v6 = vpop.f32.mrb[3].mxu1  ;;  %v3284_v7 = vpop.f32.mrb[7].mxu0  ;;  %v466_v24 = vadd.f32 %v2962_v13, %v465_v5  ;;  %v473_v26 = vpack.c.bf16 %v463_v20, %v463_v20  ;;  %v338_v27 = vadd.f32 %v2954_v19, %v337_v4  ;;  %v469_v28 = vpack.c.bf16 %v335_v23, %v335_v23  ;;  %v3562_v20 = vld [vmem:[%s4472_s2 + $0x10] sm:$0xff]   ;;  %v3564_v23 = vld [vmem:[%s4472_s2 + $0x18] sm:$0xff]  }
 0x389   :  { %v474_v29 = vpack.c.bf16 %v466_v24, %v466_v24  ;;  %v612_v30 = vsel %vm610_vm6, %v473_v26, 0  ;;  %v470_v31 = vpack.c.bf16 %v338_v27, %v338_v27  ;;  %v3565_v24 = vld [vmem:[%s4473_s4 + $0x10] sm:$0xff]  }
 0x38b   :  { %v658_v32 = vsel %vm610_vm6, %v474_v29, 0 }
 0x38c   :  { %v398_v9 = vpop.f32.mrb[4].mxu1 }
 0x38d   :  { %v399_v10 = vadd.f32 %v2958_v8, %v398_v9  ;;  %v3275_v12 = vpop.f32.mrb[5].mxu1 }
 0x38e   :  { %v401_v14 = vpop.f32.mrb[6].mxu1 }
 0x38f   :  { %v471_v15 = vpack.c.bf16 %v399_v10, %v399_v10  ;;  %v402_v17 = vadd.f32 %v2958_v8, %v401_v14  ;;  %v3276_v18 = vpop.f32.mrb[7].mxu1 }
 0x391   :  { %v480_v21 = vsel %vm475_vm5, %v471_v15, 0  ;;  %v472_v22 = vpack.c.bf16 %v402_v17, %v402_v17  ;;  %v3561_v15 = vld [vmem:[%s4476_s3 + $0x10] sm:$0xff]  }
 0x392   :  { %3286 = vmatpush3.bf16.xpose.msra.mxu1 %v480_v21  ;;  %v3563_v21 = vld [vmem:[%s4476_s3 + $0x18] sm:$0xff]  }
 0x393   :  { %v526_v25 = vsel %vm475_vm5, %v472_v22, 0  ;;  %3297 = vmatprep.subr.bf16.mxu1 %v3692_v11 }
 0x394   :  { %3292 = vmatpush3.bf16.xpose.msra.mxu0 %v526_v25  ;;  %v3566_v25 = vld [vmem:[%s4473_s4 + $0x18] sm:$0xff]  }
 0x395   :  { %3303 = vmatprep.subr.bf16.mxu0 %v3692_v11 }
 0x399   :  { %3288 = vmatmul.mubr.msk.bf16.vlgmr.msra.gmra.mrb[8].mxu1 %vm475_vm5, %v469_v28 }
 0x39a   :  { %3298 = vmatpush3.bf16.msra.mxu1 %v612_v30  ;;  %3299 = vmatprep.mubr.msk.bf16.mxu1 %vm3693_vm4, %v3692_v11 }
 0x39b   :  { %3294 = vmatmul.mubr.msk.bf16.vlgmr.msra.gmra.mrb[8].mxu0 %vm475_vm5, %v470_v31  ;;  %3309 = vmatprep.subr.bf16.mxu1 %v3692_v11 }
 0x39c   :  { %3304 = vmatpush3.bf16.msra.mxu0 %v658_v32  ;;  %3305 = vmatprep.mubr.msk.bf16.mxu0 %vm3693_vm4, %v3692_v11 }
 0x39d   :  { %3317 = vmatprep.subr.bf16.mxu0 %v3692_v11 }
 0x46c   :  { %v516_v46 = vpop.f32.mrb[8].mxu1 }
 0x46d   :  { %v3289_v47 = vpop.f32.mrb[9].mxu1  ;;  %v568_v51 = vmul.f32 0.25, %v516_v46 }
 0x46e   :  { %v519_v49 = vpop.f32.mrb[10].mxu1  ;;  %v562_v50 = vpop.f32.mrb[8].mxu0 }
 0x46f   :  { %v569_v52 = vmul.f32 0.25, %v562_v50  ;;  %v3290_v53 = vpop.f32.mrb[11].mxu1  ;;  %v3295_v54 = vpop.f32.mrb[9].mxu0  ;;  %v580_v61 = vadd.f32 %v3966_v55, %v568_v51 }
 0x470   :  { %v565_v16 = vpop.f32.mrb[10].mxu0  ;;  %v2993_v53 = vld [vmem:[%s4431_s12 + $0x1] ss:$0 sm:$0xff] }
 0x471   :  { %v3296_v56 = vpop.f32.mrb[11].mxu0  ;;  %v581_v57 = vadd.f32 %v3964_v48, %v569_v52  ;;  %v583_v63 = vsel %vm582_vm7, %v580_v61, -inf }
 0x473   :  { %v586_v58 = vsel %vm582_vm7, %v581_v57, -inf }
 0x474   :  { %587 = vmax.xlane.f32.xlu1 %v586_v58 }
 0x478   :  { %584 = vmax.xlane.f32.xlu1 %v583_v63 }
 0x501   :  { %v588_v0 = vpop.xlane.xlu1 %587 }
 0x502   :  { %v590_v1 = vsub.f32 %v581_v57, %v588_v0 }
 0x504   :  { %v593_v2 = vmul.f32 1.442695, %v590_v1 }
 0x505   :  { %v585_v3 = vpop.xlane.xlu1 %584 }
 0x506   :  { %3603 = vpow2.f32 %v593_v2  ;;  %v589_v4 = vsub.f32 %v580_v61, %v585_v3 }
 0x508   :  { %v591_v5 = vmul.f32 1.442695, %v589_v4 }
 0x50a   :  { %3605 = vpow2.f32 %v591_v5 }
 0x510   :  { %v3604_v6 = vpop.eup %3603 }
 0x511   :  { %v598_v7 = vsel %vm582_vm7, %v3604_v6, 0.0 }
 0x512   :  { %599 = vadd.xlane.f32.xlu1 %v598_v7 }
 0x514   :  { %v3606_v8 = vpop.eup %3605 }
 0x515   :  { %v595_v9 = vsel %vm582_vm7, %v3606_v8, 0.0 }
 0x516   :  { %596 = vadd.xlane.f32.xlu1 %v595_v9 }
 0x59f   :  { %v600_v10 = vpop.xlane.xlu1 %599 }
 0x5a0   :  { %3607 = vrcp.f32 %v600_v10 }
 0x5a3   :  { %v597_v12 = vpop.xlane.xlu1 %596 }
 0x5a4   :  { %3609 = vrcp.f32 %v597_v12 }
 0x5aa   :  { %v3608_v13 = vpop.eup %3607 }
 0x5ab   :  { %v604_v14 = vmul.f32 %v3608_v13, %v3604_v6 }
 0x5ad   :  { %v606_v17 = vpack.c.bf16 %v604_v14, %v604_v14 }
 0x5ae   :  { %v3610_v18 = vpop.eup %3609 }
 0x5af   :  { %v603_v19 = vmul.f32 %v3610_v18, %v3606_v8  ;;  %3306 = vmatmul.mubr.msk.bf16.vlgmr.msra.gmra.mrb[12].mxu0 %vm582_vm7, %v606_v17 }
 0x5b0   :  { %3318 = vmatpush3.bf16.msra.mxu0 %v3561_v15  ;;  %3321 = vmatprep.mubr.msk.bf16.mxu0 %vm3693_vm4, %v3692_v11 }
 0x5b1   :  { %v605_v22 = vpack.c.bf16 %v603_v19, %v603_v19  ;;  %3319 = vmatprep.subr.bf16.mxu0 %v3692_v11 }
 0x5b3   :  { %3300 = vmatmul.mubr.msk.bf16.vlgmr.msra.gmra.mrb[12].mxu1 %vm582_vm7, %v605_v22 }
 0x5b4   :  { %3310 = vmatpush3.bf16.msra.mxu1 %v3562_v20  ;;  %3320 = vmatpush3.bf16.msra.mxu0 %v3563_v21 }
 0x5b5   :  { %3311 = vmatprep.subr.bf16.mxu1 %v3692_v11  ;;  %3313 = vmatprep.mubr.msk.bf16.mxu1 %vm3693_vm4, %v3692_v11 }
 0x5b6   :  { %3333 = vmatprep.subr.bf16.mxu0 %v3692_v11 }
 0x5b7   :  { %3322 = vmatmul.mubr.msk.bf16.vlgmr.msra.gmra.mrb[16].mxu0 %vm203_vm3, %v3918_v62 }
 0x5b8   :  { %3312 = vmatpush3.bf16.msra.mxu1 %v3564_v23  ;;  %3335 = vmatprep.mubr.msk.bf16.mxu0 %vm3693_vm4, %v3692_v11 }
 0x5b9   :  { %3325 = vmatprep.subr.bf16.mxu1 %v3692_v11 }
 0x5bb   :  { %3314 = vmatmul.mubr.msk.bf16.vlgmr.msra.gmra.mrb[16].mxu1 %vm203_vm3, %v3918_v62 }
 0x5bc   :  { %3326 = vmatpush3.bf16.msra.mxu1 %v3565_v24  ;;  %3329 = vmatprep.mubr.msk.bf16.mxu1 %vm3693_vm4, %v3692_v11 }
 0x5bd   :  { %3327 = vmatprep.subr.bf16.mxu1 %v3692_v11 }
 0x5c0   :  { %3328 = vmatpush3.bf16.msra.mxu1 %v3566_v25 }
 0x5c1   :  { %3339 = vmatprep.subr.bf16.mxu1 %v3692_v11 }
 0x5c3   :  { %3330 = vmatmul.mubr.msk.bf16.vlgmr.msra.gmra.mrb[20].mxu1 %vm203_vm3, %v3918_v62 }
 0x5c4   :  { %3341 = vmatprep.mubr.msk.bf16.mxu1 %vm3693_vm4, %v3692_v11 }
 0x682   :  { %v4016_v26 = vpop.f32.mrb[12].mxu0 }
 0x683   :  { %v3307_v27 = vpop.f32.mrb[13].mxu0 }
 0x684   :  { %v697_v28 = vpop.f32.mrb[14].mxu0 }
 0x685   :  { %v3308_v29 = vpop.f32.mrb[15].mxu0 }
 0x686   :  { %v4018_v30 = vpop.f32.mrb[12].mxu1 }
 0x687   :  { %v700_v31 = vpack.c.bf16 %v4016_v26, %v4018_v30  ;;  %v3301_v32 = vpop.f32.mrb[13].mxu1 }
 0x688   :  { %v651_v33 = vpop.f32.mrb[14].mxu1 }
 0x689   :  { %v3302_v62 = vpop.f32.mrb[15].mxu1 }
 0x68a   :  { %v828_v35 = vpop.f32.mrb[16].mxu0 }
 0x68b   :  { %v829_v36 = vadd.f32 %v2984_v34, %v828_v35  ;;  %v3323_v37 = vpop.f32.mrb[17].mxu0 }
 0x68c   :  { %v831_v38 = vpop.f32.mrb[18].mxu0 }
 0x68d   :  { %v903_v39 = vpack.c.bf16 %v829_v36, %v829_v36  ;;  %v832_v40 = vadd.f32 %v2984_v34, %v831_v38  ;;  %v3324_v41 = vpop.f32.mrb[19].mxu0 }
 0x68e   :  { %v762_v43 = vpop.f32.mrb[16].mxu1 }
 0x68f   :  { %v911_v44 = vsel %vm475_vm5, %v903_v39, 0  ;;  %v904_v45 = vpack.c.bf16 %v832_v40, %v832_v40  ;;  %v3315_v46 = vpop.f32.mrb[17].mxu1  ;;  %v763_v50 = vadd.f32 %v2975_v42, %v762_v43  ;;  %v3567_v40 = vld [vmem:[%s4432_s13] sm:$0xff]  }
 0x690   :  { %v765_v47 = vpop.f32.mrb[18].mxu1  ;;  %3334 = vmatpush3.bf16.xpose.msra.mxu0 %v911_v44 }
 0x691   :  { %v957_v49 = vsel %vm475_vm5, %v904_v45, 0  ;;  %v3316_v51 = vpop.f32.mrb[19].mxu1  ;;  %3345 = vmatprep.subr.bf16.mxu0 %v3692_v11  ;;  %v766_v52 = vadd.f32 %v2975_v42, %v765_v47  ;;  %v901_v54 = vpack.c.bf16 %v763_v50, %v763_v50  ;;  %v3568_v42 = vld [vmem:[%s4432_s13 + $0x8] sm:$0xff]  }
 0x692   :  { %3340 = vmatpush3.bf16.xpose.msra.mxu1 %v957_v49 }
 0x693   :  { %3351 = vmatprep.subr.bf16.mxu1 %v3692_v11  ;;  %v902_v56 = vpack.c.bf16 %v766_v52, %v766_v52 }
 0x696   :  { %v894_v16 = vpop.f32.mrb[20].mxu1 }
 0x697   :  { %v895_v57 = vadd.f32 %v2993_v53, %v894_v16  ;;  %v3331_v58 = vpop.f32.mrb[21].mxu1  ;;  %3336 = vmatmul.mubr.msk.bf16.vlgmr.msra.gmra.mrb[20].mxu0 %vm475_vm5, %v901_v54  ;;  %v3007_v16 = vld [vmem:[%s4433_s14] ss:$0 sm:$0xff] }
 0x698   :  { %v897_v61 = vpop.f32.mrb[22].mxu1  ;;  %3347 = vmatprep.mubr.msk.bf16.mxu0 %vm3693_vm4, %v3692_v11 }
 0x699   :  { %v905_v63 = vpack.c.bf16 %v895_v57, %v895_v57  ;;  %v898_v0 = vadd.f32 %v2993_v53, %v897_v61  ;;  %v3332_v1 = vpop.f32.mrb[23].mxu1  ;;  %3342 = vmatmul.mubr.msk.bf16.vlgmr.msra.gmra.mrb[24].mxu1 %vm475_vm5, %v902_v56 }
 0x69a   :  { %3353 = vmatprep.mubr.msk.bf16.mxu1 %vm3693_vm4, %v3692_v11 }
 0x69b   :  { %v1031_v2 = vsel %vm610_vm6, %v905_v63, 0  ;;  %v906_v3 = vpack.c.bf16 %v898_v0, %v898_v0 }
 0x69c   :  { %3346 = vmatpush3.bf16.msra.mxu0 %v1031_v2 }
 0x69d   :  { %v1077_v4 = vsel %vm610_vm6, %v906_v3, 0  ;;  %3357 = vmatprep.subr.bf16.mxu0 %v3692_v11 }
 0x69e   :  { %3352 = vmatpush3.bf16.msra.mxu1 %v1077_v4 }
 0x69f   :  { %3363 = vmatprep.subr.bf16.mxu1 %v3692_v11 }
 0x76a   :  { %v947_v5 = vpop.f32.mrb[20].mxu0 }
 0x76b   :  { %v999_v6 = vmul.f32 0.25, %v947_v5  ;;  %v3337_v7 = vpop.f32.mrb[21].mxu0 }
 0x76c   :  { %v950_v8 = vpop.f32.mrb[22].mxu0  ;;  %v993_v9 = vpop.f32.mrb[24].mxu1 }
 0x76d   :  { %v1000_v10 = vmul.f32 0.25, %v993_v9  ;;  %v3338_v12 = vpop.f32.mrb[23].mxu0  ;;  %v3343_v13 = vpop.f32.mrb[25].mxu1  ;;  %v1001_v14 = vadd.f32 %v999_v6, %v3966_v55 }
 0x76e   :  { %v996_v15 = vpop.f32.mrb[26].mxu1 }
 0x76f   :  { %v3344_v17 = vpop.f32.mrb[27].mxu1  ;;  %v1003_v18 = vsel %vm582_vm7, %v1001_v14, -inf  ;;  %v1002_v19 = vadd.f32 %v1000_v10, %v3964_v48 }
 0x770   :  { %1004 = vmax.xlane.f32.xlu1 %v1003_v18  ;;  %v3570_v17 = vld [vmem:[%s4436_s17 + $0x8] sm:$0xff]  }
 0x771   :  { %v1006_v20 = vsel %vm582_vm7, %v1002_v19, -inf }
 0x774   :  { %1007 = vmax.xlane.f32.xlu1 %v1006_v20 }
 0x7fd   :  { %v1005_v21 = vpop.xlane.xlu1 %1004 }
 0x7fe   :  { %v1009_v22 = vsub.f32 %v1001_v14, %v1005_v21 }
 0x800   :  { %v1011_v23 = vmul.f32 1.442695, %v1009_v22 }
 0x801   :  { %v1008_v24 = vpop.xlane.xlu1 %1007 }
 0x802   :  { %3611 = vpow2.f32 %v1011_v23  ;;  %v1010_v25 = vsub.f32 %v1002_v19, %v1008_v24 }
 0x804   :  { %v1013_v27 = vmul.f32 1.442695, %v1010_v25  ;;  %v3008_v25 = vld [vmem:[%s4434_s15] ss:$0 sm:$0xff] }
 0x806   :  { %3613 = vpow2.f32 %v1013_v27 }
 0x80c   :  { %v3612_v28 = vpop.eup %3611 }
 0x80d   :  { %v1015_v29 = vsel %vm582_vm7, %v3612_v28, 0.0 }
 0x80e   :  { %1016 = vadd.xlane.f32.xlu1 %v1015_v29 }
 0x810   :  { %v3614_v32 = vpop.eup %3613 }
 0x811   :  { %v1018_v33 = vsel %vm582_vm7, %v3614_v32, 0.0 }
 0x812   :  { %1019 = vadd.xlane.f32.xlu0 %v1018_v33  ;;  %v3009_v33 = vld [vmem:[%s4435_s16] ss:$0 sm:$0xff] }
 0x89b   :  { %v1017_v34 = vpop.xlane.xlu1 %1016 }
 0x89c   :  { %3615 = vrcp.f32 %v1017_v34 }
 0x89f   :  { %v1020_v62 = vpop.xlane.xlu0 %1019 }
 0x8a0   :  { %3617 = vrcp.f32 %v1020_v62 }
 0x8a6   :  { %v3616_v35 = vpop.eup %3615 }
 0x8a7   :  { %v1023_v36 = vmul.f32 %v3616_v35, %v3612_v28 }
 0x8a9   :  { %v1025_v37 = vpack.c.bf16 %v1023_v36, %v1023_v36 }
 0x8aa   :  { %v3618_v38 = vpop.eup %3617 }
 0x8ab   :  { %v1024_v39 = vmul.f32 %v3618_v38, %v3614_v32  ;;  %3348 = vmatmul.mubr.msk.bf16.vlgmr.msra.gmra.mrb[24].mxu0 %vm582_vm7, %v1025_v37  ;;  %v3571_v37 = vld [vmem:[%s4438_s19] sm:$0xff]   ;;  %v3572_v38 = vld [vmem:[%s4438_s19 + $0x8] sm:$0xff]  }
 0x8ac   :  { %3359 = vmatprep.mubr.msk.bf16.mxu0 %vm3693_vm4, %v3692_v11  ;;  %3358 = vmatpush3.bf16.msra.mxu0 %v3568_v42 }
 0x8ad   :  { %v1026_v41 = vpack.c.bf16 %v1024_v39, %v1024_v39  ;;  %3369 = vmatprep.subr.bf16.mxu0 %v3692_v11  ;;  %v3573_v39 = vld [vmem:[%s4438_s19 + $0x10] sm:$0xff]  }
 0x8af   :  { %3354 = vmatmul.mubr.msk.bf16.vlgmr.msra.gmra.mrb[28].mxu1 %vm582_vm7, %v1026_v41  ;;  %v3010_v41 = vld [vmem:[%s4437_s18] ss:$0 sm:$0xff] }
 0x8b0   :  { %3364 = vmatpush3.bf16.msra.mxu1 %v3567_v40  ;;  %3365 = vmatprep.mubr.msk.bf16.mxu1 %vm3693_vm4, %v3692_v11  ;;  %v3574_v40 = vld [vmem:[%s4438_s19 + $0x18] sm:$0xff]  }
 0x8b1   :  { %3377 = vmatprep.subr.bf16.mxu1 %v3692_v11 }
 0x8b7   :  { %3366 = vmatmul.mubr.msk.bf16.vlgmr.msra.gmra.mrb[32].mxu1 %vm475_vm5, %v700_v31 }
 0x8b8   :  { %3385 = vmatprep.mubr.msk.bf16.mxu1 %vm3693_vm4, %v3692_v11  ;;  %3378 = vmatpush3.bf16.msra.mxu1 %v3571_v37 }
 0x8b9   :  { %3379 = vmatprep.subr.bf16.mxu1 %v3692_v11 }
 0x8bc   :  { %3380 = vmatpush3.bf16.msra.mxu1 %v3572_v38 }
 0x8bd   :  { %3381 = vmatprep.subr.bf16.mxu1 %v3692_v11 }
 0x8c0   :  { %3382 = vmatpush3.bf16.msra.mxu1 %v3573_v39 }
 0x8c1   :  { %3383 = vmatprep.subr.bf16.mxu1 %v3692_v11 }
 0x8c4   :  { %3384 = vmatpush3.bf16.msra.mxu1 %v3574_v40  ;;  %v3014_v40 = vld [vmem:[%s4439_s20] ss:$0 sm:$0xff] }
 0x8c5   :  { %3405 = vmatprep.subr.bf16.mxu1 %v3692_v11 }
 0x97e   :  { %v1067_v43 = vpop.f32.mrb[24].mxu0 }
 0x97f   :  { %v3349_v44 = vpop.f32.mrb[25].mxu0 }
 0x980   :  { %v1070_v45 = vpop.f32.mrb[26].mxu0 }
 0x981   :  { %v3350_v46 = vpop.f32.mrb[27].mxu0 }
 0x982   :  { %v1113_v47 = vpop.f32.mrb[28].mxu1 }
 0x983   :  { %v1119_v49 = vpack.c.bf16 %v1113_v47, %v1067_v43  ;;  %v3355_v50 = vpop.f32.mrb[29].mxu1 }
 0x984   :  { %v1116_v26 = vpop.f32.mrb[30].mxu1 }
 0x985   :  { %v3356_v30 = vpop.f32.mrb[31].mxu1  ;;  %3360 = vmatmul.mubr.msk.bf16.vlgmr.msra.gmra.mrb[28].mxu0 %vm475_vm5, %v1119_v49 }
 0x986   :  { %3373 = vmatprep.mubr.msk.bf16.mxu0 %vm3693_vm4, %v3692_v11 }
 0x98a   :  { %v1216_v31 = vpop.f32.mrb[32].mxu1 }
 0x98b   :  { %v3367_v51 = vpop.f32.mrb[33].mxu1 }
 0x98c   :  { %v1219_v52 = vpop.f32.mrb[34].mxu1 }
 0x98d   :  { %v3368_v53 = vpop.f32.mrb[35].mxu1 }
 0xa58   :  { %v1166_v54 = vpop.f32.mrb[28].mxu0 }
 0xa59   :  { %v1217_v56 = vadd.f32 %v1216_v31, %v1166_v54  ;;  %v3361_v57 = vpop.f32.mrb[29].mxu0 }
 0xa5a   :  { %v1169_v58 = vpop.f32.mrb[30].mxu0 }
 0xa5b   :  { %v1230_v61 = vadd.f32 %v3007_v16, %v1217_v56  ;;  %v1220_v63 = vadd.f32 %v1219_v52, %v1169_v58  ;;  %v3362_v0 = vpop.f32.mrb[31].mxu0 }
 0xa5d   :  { %v1231_v1 = vadd.f32 %v3007_v16, %v1220_v63  ;;  %v1232_v2 = vadd.f32 %v1230_v61, %v3909_v59 }
 0xa5f   :  { %v1236_v3 = vsel %vm203_vm3, %v1232_v2, 0.0  ;;  %v1233_v4 = vadd.f32 %v1231_v1, %v3911_v60  ;;  %v3569_v60 = vld [vmem:[%s4436_s17] sm:$0xff]  }
 0xa60   :  { %1237 = vadd.xlane.f32.xlu1 %v1236_v3  ;;  %3370 = vmatpush3.bf16.msra.mxu0 %v3569_v60 }
 0xa61   :  { %v1239_v5 = vsel %vm203_vm3, %v1233_v4, 0.0  ;;  %3371 = vmatprep.subr.bf16.mxu0 %v3692_v11 }
 0xa62   :  { %1240 = vadd.xlane.f32.xlu0 %v1239_v5 }
 0xa64   :  { %3372 = vmatpush3.bf16.msra.mxu0 %v3570_v17 }
 0xa65   :  { %3389 = vmatprep.subr.bf16.mxu0 %v3692_v11 }
 0xaed   :  { %v1238_v6 = vpop.xlane.xlu1 %1237 }
 0xaee   :  { %v1242_v7 = vmul.f32 0.03125, %v1238_v6 }
 0xaef   :  { %v1241_v8 = vpop.xlane.xlu0 %1240 }
 0xaf0   :  { %v1244_v9 = vsub.f32 %v1232_v2, %v1242_v7  ;;  %v1243_v10 = vmul.f32 0.03125, %v1241_v8 }
 0xaf2   :  { %v1245_v12 = vsub.f32 %v1233_v4, %v1243_v10  ;;  %v1246_v13 = vmul.f32 %v1244_v9, %v1244_v9 }
 0xaf4   :  { %v1248_v14 = vsel %vm203_vm3, %v1246_v13, 0.0  ;;  %v1247_v15 = vmul.f32 %v1245_v12, %v1245_v12 }
 0xaf5   :  { %1249 = vadd.xlane.f32.xlu1 %v1248_v14 }
 0xaf6   :  { %v1251_v59 = vsel %vm203_vm3, %v1247_v15, 0.0 }
 0xaf7   :  { %1252 = vadd.xlane.f32.xlu0 %v1251_v59 }
 0xb82   :  { %v1250_v18 = vpop.xlane.xlu1 %1249 }
 0xb83   :  { %v1254_v19 = vmul.f32 0.03125, %v1250_v18 }
 0xb84   :  { %v1253_v20 = vpop.xlane.xlu0 %1252 }
 0xb85   :  { %v1256_v21 = vadd.f32 1e-12, %v1254_v19  ;;  %v1255_v22 = vmul.f32 0.03125, %v1253_v20 }
 0xb87   :  { %3619 = vrsqrt.f32 %v1256_v21  ;;  %v1257_v23 = vadd.f32 1e-12, %v1255_v22 }
 0xb89   :  { %3621 = vrsqrt.f32 %v1257_v23 }
 0xb91   :  { %v3620_v24 = vpop.eup %3619 }
 0xb92   :  { %v1260_v27 = vmul.f32 %v3620_v24, %v1244_v9 }
 0xb93   :  { %v3622_v28 = vpop.eup %3621 }
 0xb94   :  { %v1268_v29 = vmul.f32 %v3008_v25, %v1260_v27  ;;  %v1261_v32 = vmul.f32 %v3622_v28, %v1245_v12 }
 0xb96   :  { %v1269_v34 = vmul.f32 %v3008_v25, %v1261_v32  ;;  %v4097_v62 = vadd.f32 %v3009_v33, %v1268_v29 }
 0xb98   :  { %v4099_v35 = vadd.f32 %v3009_v33, %v1269_v34 }
 0xb9a   :  { %v1278_v36 = vpack.c.bf16 %v4099_v35, %v4097_v62 }
 0xb9c   :  { %3374 = vmatmul.mubr.msk.bf16.vlgmr.msra.gmra.mrb[32].mxu0 %vm203_vm3, %v1278_v36 }
 0xb9d   :  { %3393 = vmatprep.mubr.msk.bf16.mxu0 %vm3693_vm4, %v3692_v11 }
 0xc6f   :  { %v1339_v42 = vpop.f32.mrb[32].mxu0 }
 0xc70   :  { %v1340_v43 = vadd.f32 %v3010_v41, %v1339_v42  ;;  %v3375_v44 = vpop.f32.mrb[33].mxu0 }
 0xc71   :  { %v1342_v45 = vpop.f32.mrb[34].mxu0 }
 0xc72   :  { %v1348_v46 = vmul.f32 0.70710677, %v1340_v43  ;;  %v1343_v47 = vadd.f32 %v3010_v41, %v1342_v45  ;;  %v3376_v49 = vpop.f32.mrb[35].mxu0  ;;  %v1346_v33 = vmul.f32 0.5, %v1340_v43 }
 0xc74   :  { %v1350_v50 = vand.u32 2147483647, %v1348_v46  ;;  %v1349_v26 = vmul.f32 0.70710677, %v1343_v47  ;;  %vm1390_vm8 = vcmp.ge.f32.partialorder %v1348_v46, 0.0  ;;  %v1347_v34 = vmul.f32 0.5, %v1343_v47 }
 0xc76   :  { %v1352_v30 = vmul.f32 0.3275911, %v1350_v50  ;;  %v1351_v31 = vand.u32 2147483647, %v1349_v26  ;;  %v1378_v54 = vsub.f32 0.0, %v1350_v50  ;;  %vm1391_vm9 = vcmp.ge.f32.partialorder %v1349_v26, 0.0 }
 0xc78   :  { %v1354_v51 = vadd.f32 1.0, %v1352_v30  ;;  %v1353_v52 = vmul.f32 0.3275911, %v1351_v31  ;;  %v1379_v16 = vsub.f32 0.0, %v1351_v31  ;;  %v1380_v57 = vmul.f32 %v1378_v54, %v1350_v50 }
 0xc7a   :  { %3623 = vrcp.f32 %v1354_v51  ;;  %v1355_v53 = vadd.f32 1.0, %v1353_v52  ;;  %v1381_v0 = vmul.f32 %v1379_v16, %v1351_v31  ;;  %v1382_v1 = vmul.f32 1.442695, %v1380_v57 }
 0xc7c   :  { %3625 = vrcp.f32 %v1355_v53  ;;  %v1384_v6 = vmul.f32 1.442695, %v1381_v0 }
 0xc7d   :  { %3627 = vpow2.f32 %v1382_v1 }
 0xc7e   :  { %3629 = vpow2.f32 %v1384_v6 }
 0xc84   :  { %v3624_v56 = vpop.eup %3623 }
 0xc85   :  { %v1360_v58 = vmul.f32 1.0614054, %v3624_v56 }
 0xc86   :  { %v3626_v61 = vpop.eup %3625 }
 0xc87   :  { %v1362_v63 = vadd.f32 -1.4531521, %v1360_v58  ;;  %v1361_v2 = vmul.f32 1.0614054, %v3626_v61  ;;  %v3628_v17 = vpop.eup %3627  ;;  %v3576_v58 = vld [vmem:[%s4473_s4 + $0x20] sm:$0xff]  }
 0xc88   :  { %v3630_v21 = vpop.eup %3629 }
 0xc89   :  { %v1364_v3 = vmul.f32 %v3624_v56, %v1362_v63  ;;  %v1363_v4 = vadd.f32 -1.4531521, %v1361_v2  ;;  %v3578_v63 = vld [vmem:[%s4473_s4 + $0x28] sm:$0xff]  }
 0xc8b   :  { %v1366_v5 = vadd.f32 1.4214138, %v1364_v3  ;;  %v1365_v7 = vmul.f32 %v3626_v61, %v1363_v4 }
 0xc8d   :  { %v1368_v8 = vmul.f32 %v3624_v56, %v1366_v5  ;;  %v1367_v9 = vadd.f32 1.4214138, %v1365_v7  ;;  %v3020_v7 = vld [vmem:[%s4440_s21] ss:$0 sm:$0xff] }
 0xc8f   :  { %v1370_v10 = vadd.f32 -0.28449672, %v1368_v8  ;;  %v1369_v12 = vmul.f32 %v3626_v61, %v1367_v9 }
 0xc91   :  { %v1372_v13 = vmul.f32 %v3624_v56, %v1370_v10  ;;  %v1371_v14 = vadd.f32 -0.28449672, %v1369_v12 }
 0xc93   :  { %v1374_v15 = vadd.f32 0.2548296, %v1372_v13  ;;  %v1373_v59 = vmul.f32 %v3626_v61, %v1371_v14  ;;  %v3021_v13 = vld [vmem:[%s4480_s30] ss:$0 sm:$0xff] }
 0xc95   :  { %v1376_v60 = vmul.f32 %v3624_v56, %v1374_v15  ;;  %v1375_v18 = vadd.f32 0.2548296, %v1373_v59 }
 0xc97   :  { %v1386_v19 = vmul.f32 %v3628_v17, %v1376_v60  ;;  %v1377_v20 = vmul.f32 %v3626_v61, %v1375_v18  ;;  %v3577_v61 = vld [vmem:[%s4472_s2 + $0x28] sm:$0xff]   ;;  %v3579_v60 = vld [vmem:[%s4476_s3 + $0x20] sm:$0xff]  }
 0xc98   :  { %v3580_v18 = vld [vmem:[%s4476_s3 + $0x28] sm:$0xff]  }
 0xc99   :  { %v1388_v22 = vsub.f32 1.0, %v1386_v19  ;;  %v1387_v23 = vmul.f32 %v3630_v21, %v1377_v20 }
 0xc9b   :  { %v1392_v24 = vsub.f32 0.0, %v1388_v22  ;;  %v1389_v25 = vsub.f32 1.0, %v1387_v23 }
 0xc9d   :  { %v1394_v27 = vsel %vm1390_vm8, %v1388_v22, %v1392_v24  ;;  %v1393_v28 = vsub.f32 0.0, %v1389_v25 }
 0xc9e   :  { %v1396_v29 = vadd.f32 1.0, %v1394_v27 }
 0xc9f   :  { %v1395_v32 = vsel %vm1391_vm9, %v1389_v25, %v1393_v28  ;;  %v3036_v28 = vld [vmem:[%s4477_s5 + $0x2] ss:$0 sm:$0xff] }
 0xca0   :  { %v1397_v36 = vadd.f32 1.0, %v1395_v32  ;;  %v1398_v37 = vmul.f32 %v1396_v29, %v1346_v33 }
 0xca2   :  { %v1399_v38 = vmul.f32 %v1397_v36, %v1347_v34  ;;  %v3045_v34 = vld [vmem:[%s4431_s12 + $0x2] ss:$0 sm:$0xff] }
 0xca4   :  { %v1400_v39 = vpack.c.bf16 %v1399_v38, %v1398_v37 }
 0xca6   :  { %3386 = vmatmul.mubr.msk.bf16.vlgmr.msra.gmra.mrb[36].mxu1 %vm110_vm0, %v1400_v39 }
 0xca7   :  { %3409 = vmatprep.mubr.msk.bf16.mxu1 %vm3693_vm4, %v3692_v11  ;;  %3406 = vmatpush3.bf16.msra.mxu1 %v3576_v58 }
 0xca8   :  { %3407 = vmatprep.subr.bf16.mxu1 %v3692_v11 }
 0xcab   :  { %3408 = vmatpush3.bf16.msra.mxu1 %v3578_v63 }
 0xcac   :  { %3419 = vmatprep.subr.bf16.mxu1 %v3692_v11 }
 0xd79   :  { %v1477_v41 = vpop.f32.mrb[36].mxu1 }
 0xd7a   :  { %v1478_v42 = vadd.f32 %v3014_v40, %v1477_v41  ;;  %v3387_v44 = vpop.f32.mrb[37].mxu1 }
 0xd7b   :  { %v1480_v45 = vpop.f32.mrb[38].mxu1 }
 0xd7c   :  { %v1481_v46 = vadd.f32 %v3014_v40, %v1480_v45  ;;  %v3388_v43 = vpop.f32.mrb[39].mxu1  ;;  %v1484_v47 = vadd.f32 %v1478_v42, %v4097_v62  ;;  %v3027_v40 = vld [vmem:[%s4478_s29 + $0x2] ss:$0 sm:$0xff] }
 0xd7e   :  { %v1488_v49 = vsel %vm203_vm3, %v1484_v47, 0.0  ;;  %v1485_v50 = vadd.f32 %v1481_v46, %v4099_v35  ;;  %v3575_v35 = vld [vmem:[%s4472_s2 + $0x20] sm:$0xff]  }
 0xd7f   :  { %1489 = vadd.xlane.f32.xlu1 %v1488_v49  ;;  %3390 = vmatpush3.bf16.msra.mxu0 %v3575_v35 }
 0xd80   :  { %v1491_v26 = vsel %vm203_vm3, %v1485_v50, 0.0  ;;  %3391 = vmatprep.subr.bf16.mxu0 %v3692_v11 }
 0xd81   :  { %1492 = vadd.xlane.f32.xlu0 %v1491_v26 }
 0xd83   :  { %3392 = vmatpush3.bf16.msra.mxu0 %v3577_v61 }
 0xd84   :  { %3397 = vmatprep.subr.bf16.mxu0 %v3692_v11 }
 0xe0c   :  { %v1490_v30 = vpop.xlane.xlu1 %1489 }
 0xe0d   :  { %v1494_v31 = vmul.f32 0.03125, %v1490_v30 }
 0xe0e   :  { %v1493_v51 = vpop.xlane.xlu0 %1492 }
 0xe0f   :  { %v1496_v52 = vsub.f32 %v1484_v47, %v1494_v31  ;;  %v1495_v53 = vmul.f32 0.03125, %v1493_v51 }
 0xe11   :  { %v1497_v54 = vsub.f32 %v1485_v50, %v1495_v53  ;;  %v1498_v16 = vmul.f32 %v1496_v52, %v1496_v52 }
 0xe13   :  { %v1500_v56 = vsel %vm203_vm3, %v1498_v16, 0.0  ;;  %v1499_v57 = vmul.f32 %v1497_v54, %v1497_v54 }
 0xe14   :  { %1501 = vadd.xlane.f32.xlu1 %v1500_v56 }
 0xe15   :  { %v1503_v62 = vsel %vm203_vm3, %v1499_v57, 0.0 }
 0xe16   :  { %1504 = vadd.xlane.f32.xlu0 %v1503_v62 }
 0xea1   :  { %v1502_v0 = vpop.xlane.xlu1 %1501 }
 0xea2   :  { %v1506_v1 = vmul.f32 0.03125, %v1502_v0 }
 0xea3   :  { %v1505_v2 = vpop.xlane.xlu0 %1504 }
 0xea4   :  { %v1508_v3 = vadd.f32 1e-12, %v1506_v1  ;;  %v1507_v4 = vmul.f32 0.03125, %v1505_v2 }
 0xea6   :  { %3631 = vrsqrt.f32 %v1508_v3  ;;  %v1509_v5 = vadd.f32 1e-12, %v1507_v4 }
 0xea8   :  { %3633 = vrsqrt.f32 %v1509_v5 }
 0xeb0   :  { %v3632_v6 = vpop.eup %3631 }
 0xeb1   :  { %v1512_v8 = vmul.f32 %v3632_v6, %v1496_v52 }
 0xeb2   :  { %v3634_v9 = vpop.eup %3633 }
 0xeb3   :  { %v1520_v10 = vmul.f32 %v3020_v7, %v1512_v8  ;;  %v1513_v12 = vmul.f32 %v3634_v9, %v1497_v54 }
 0xeb5   :  { %v1521_v14 = vmul.f32 %v3020_v7, %v1513_v12  ;;  %v4159_v15 = vadd.f32 %v3021_v13, %v1520_v10 }
 0xeb7   :  { %v4161_v59 = vadd.f32 %v3021_v13, %v1521_v14 }
 0xeb9   :  { %v4168_v17 = vpack.c.bf16 %v4161_v59, %v4159_v15 }
 0xebb   :  { %3394 = vmatmul.mubr.msk.bf16.vlgmr.msra.gmra.mrb[36].mxu0 %vm203_vm3, %v4168_v17  ;;  %3410 = vmatmul.mubr.msk.bf16.vlgmr.msra.gmra.mrb[40].mxu1 %vm203_vm3, %v4168_v17 }
 0xebc   :  { %3398 = vmatpush3.bf16.msra.mxu0 %v3579_v60  ;;  %3401 = vmatprep.mubr.msk.bf16.mxu0 %vm3693_vm4, %v3692_v11 }
 0xebd   :  { %3399 = vmatprep.subr.bf16.mxu0 %v3692_v11  ;;  %3421 = vmatprep.mubr.msk.bf16.mxu1 %vm3693_vm4, %v3692_v11 }
 0xec0   :  { %3400 = vmatpush3.bf16.msra.mxu0 %v3580_v18 }
 0xec1   :  { %3413 = vmatprep.subr.bf16.mxu0 %v3692_v11 }
 0xec3   :  { %3402 = vmatmul.mubr.msk.bf16.vlgmr.msra.gmra.mrb[40].mxu0 %vm203_vm3, %v4168_v17 }
 0xec4   :  { %3415 = vmatprep.mubr.msk.bf16.mxu0 %vm3693_vm4, %v3692_v11 }
 0xf8e   :  { %v1593_v19 = vpop.f32.mrb[36].mxu0  ;;  %v1725_v20 = vpop.f32.mrb[40].mxu1 }
 0xf8f   :  { %v3395_v21 = vpop.f32.mrb[37].mxu0  ;;  %v3411_v22 = vpop.f32.mrb[41].mxu1  ;;  %v1726_v41 = vadd.f32 %v3045_v34, %v1725_v20  ;;  %v1594_v45 = vadd.f32 %v3027_v40, %v1593_v19 }
 0xf90   :  { %v1596_v23 = vpop.f32.mrb[38].mxu0  ;;  %v1728_v24 = vpop.f32.mrb[42].mxu1  ;;  %v3581_v21 = vld [vmem:[%s4472_s2 + $0x30] sm:$0xff]  }
 0xf91   :  { %v3396_v25 = vpop.f32.mrb[39].mxu0  ;;  %v3412_v27 = vpop.f32.mrb[43].mxu1  ;;  %v1729_v46 = vadd.f32 %v3045_v34, %v1728_v24  ;;  %v1736_v47 = vpack.c.bf16 %v1726_v41, %v1726_v41  ;;  %v1597_v49 = vadd.f32 %v3027_v40, %v1596_v23  ;;  %v1732_v50 = vpack.c.bf16 %v1594_v45, %v1594_v45  ;;  %v3582_v24 = vld [vmem:[%s4476_s3 + $0x30] sm:$0xff]  }
 0xf92   :  { %v3583_v27 = vld [vmem:[%s4472_s2 + $0x38] sm:$0xff]  }
 0xf93   :  { %v1737_v26 = vpack.c.bf16 %v1729_v46, %v1729_v46  ;;  %v1862_v30 = vsel %vm610_vm6, %v1736_v47, 0  ;;  %v1733_v31 = vpack.c.bf16 %v1597_v49, %v1597_v49 }
 0xf95   :  { %v1908_v51 = vsel %vm610_vm6, %v1737_v26, 0 }
 0xf96   :  { %v1659_v29 = vpop.f32.mrb[40].mxu0 }
 0xf97   :  { %v1660_v32 = vadd.f32 %v3036_v28, %v1659_v29  ;;  %v3403_v33 = vpop.f32.mrb[41].mxu0  ;;  %v3585_v29 = vld [vmem:[%s4473_s4 + $0x30] sm:$0xff]  }
 0xf98   :  { %v1662_v36 = vpop.f32.mrb[42].mxu0 }
 0xf99   :  { %v1734_v37 = vpack.c.bf16 %v1660_v32, %v1660_v32  ;;  %v1663_v38 = vadd.f32 %v3036_v28, %v1662_v36  ;;  %v3404_v39 = vpop.f32.mrb[43].mxu0  ;;  %v3584_v28 = vld [vmem:[%s4476_s3 + $0x38] sm:$0xff]  }
 0xf9a   :  { %v3586_v32 = vld [vmem:[%s4473_s4 + $0x38] sm:$0xff]  }
 0xf9b   :  { %v1742_v42 = vsel %vm475_vm5, %v1734_v37, 0  ;;  %v1735_v44 = vpack.c.bf16 %v1663_v38, %v1663_v38 }
 0xf9c   :  { %3414 = vmatpush3.bf16.xpose.msra.mxu0 %v1742_v42 }
 0xf9d   :  { %v1788_v43 = vsel %vm475_vm5, %v1735_v44, 0  ;;  %3425 = vmatprep.subr.bf16.mxu0 %v3692_v11 }
 0xf9e   :  { %3420 = vmatpush3.bf16.xpose.msra.mxu1 %v1788_v43 }
 0xf9f   :  { %3431 = vmatprep.subr.bf16.mxu1 %v3692_v11 }
 0xfa3   :  { %3416 = vmatmul.mubr.msk.bf16.vlgmr.msra.gmra.mrb[44].mxu0 %vm475_vm5, %v1732_v50 }
 0xfa4   :  { %3426 = vmatpush3.bf16.msra.mxu0 %v1862_v30  ;;  %3427 = vmatprep.mubr.msk.bf16.mxu0 %vm3693_vm4, %v3692_v11 }
 0xfa5   :  { %3422 = vmatmul.mubr.msk.bf16.vlgmr.msra.gmra.mrb[44].mxu1 %vm475_vm5, %v1733_v31  ;;  %3437 = vmatprep.subr.bf16.mxu0 %v3692_v11 }
 0xfa6   :  { %3432 = vmatpush3.bf16.msra.mxu1 %v1908_v51  ;;  %3433 = vmatprep.mubr.msk.bf16.mxu1 %vm3693_vm4, %v3692_v11 }
 0xfa7   :  { %3445 = vmatprep.subr.bf16.mxu1 %v3692_v11 }
0x1076   :  { %v1778_v52 = vpop.f32.mrb[44].mxu0 }
0x1077   :  { %v1830_v53 = vmul.f32 0.25, %v1778_v52  ;;  %v3417_v54 = vpop.f32.mrb[45].mxu0  ;;  %v3060_v52 = vld [vmem:[%s4478_s29 + $0x3] ss:$0 sm:$0xff] }
0x1078   :  { %v1781_v16 = vpop.f32.mrb[46].mxu0  ;;  %v1824_v56 = vpop.f32.mrb[44].mxu1 }
0x1079   :  { %v1831_v57 = vmul.f32 0.25, %v1824_v56  ;;  %v3418_v62 = vpop.f32.mrb[47].mxu0  ;;  %v3423_v35 = vpop.f32.mrb[45].mxu1  ;;  %v1832_v58 = vadd.f32 %v1830_v53, %v3966_v55  ;;  %v3078_v53 = vld [vmem:[%s4431_s12 + $0x3] ss:$0 sm:$0xff] }
0x107a   :  { %v1827_v61 = vpop.f32.mrb[46].mxu1 }
0x107b   :  { %v3424_v63 = vpop.f32.mrb[47].mxu1  ;;  %v1834_v0 = vsel %vm582_vm7, %v1832_v58, -inf  ;;  %v1833_v1 = vadd.f32 %v1831_v57, %v3964_v48 }
0x107c   :  { %1835 = vmax.xlane.f32.xlu0 %v1834_v0 }
0x107d   :  { %v1837_v2 = vsel %vm582_vm7, %v1833_v1, -inf }
0x107e   :  { %1838 = vmax.xlane.f32.xlu1 %v1837_v2 }
0x1109   :  { %v1836_v3 = vpop.xlane.xlu0 %1835 }
0x110a   :  { %v1840_v4 = vsub.f32 %v1832_v58, %v1836_v3 }
0x110b   :  { %v1839_v5 = vpop.xlane.xlu1 %1838 }
0x110c   :  { %v1842_v6 = vmul.f32 1.442695, %v1840_v4  ;;  %v1841_v7 = vsub.f32 %v1833_v1, %v1839_v5 }
0x110e   :  { %3635 = vpow2.f32 %v1842_v6  ;;  %v1844_v8 = vmul.f32 1.442695, %v1841_v7 }
0x1110   :  { %3637 = vpow2.f32 %v1844_v8 }
0x1118   :  { %v3636_v9 = vpop.eup %3635 }
0x1119   :  { %v1846_v10 = vsel %vm582_vm7, %v3636_v9, 0.0 }
0x111a   :  { %v3638_v12 = vpop.eup %3637  ;;  %1847 = vadd.xlane.f32.xlu0 %v1846_v10 }
0x111b   :  { %v1849_v13 = vsel %vm582_vm7, %v3638_v12, 0.0 }
0x111c   :  { %1850 = vadd.xlane.f32.xlu1 %v1849_v13 }
0x11a7   :  { %v1848_v14 = vpop.xlane.xlu0 %1847 }
0x11a8   :  { %3639 = vrcp.f32 %v1848_v14 }
0x11a9   :  { %v1851_v60 = vpop.xlane.xlu1 %1850 }
0x11aa   :  { %3641 = vrcp.f32 %v1851_v60 }
0x11b2   :  { %v3640_v18 = vpop.eup %3639 }
0x11b3   :  { %v1854_v19 = vmul.f32 %v3640_v18, %v3636_v9 }
0x11b4   :  { %v3642_v20 = vpop.eup %3641 }
0x11b5   :  { %v1855_v22 = vmul.f32 %v3642_v20, %v3638_v12  ;;  %v1856_v23 = vpack.c.bf16 %v1854_v19, %v1854_v19 }
0x11b7   :  { %3428 = vmatmul.mubr.msk.bf16.vlgmr.msra.gmra.mrb[48].mxu0 %vm582_vm7, %v1856_v23  ;;  %v1857_v25 = vpack.c.bf16 %v1855_v22, %v1855_v22 }
0x11b8   :  { %3438 = vmatpush3.bf16.msra.mxu0 %v3581_v21  ;;  %3441 = vmatprep.mubr.msk.bf16.mxu0 %vm3693_vm4, %v3692_v11 }
0x11b9   :  { %3434 = vmatmul.mubr.msk.bf16.vlgmr.msra.gmra.mrb[48].mxu1 %vm582_vm7, %v1857_v25  ;;  %3439 = vmatprep.subr.bf16.mxu0 %v3692_v11 }
0x11ba   :  { %3446 = vmatpush3.bf16.msra.mxu1 %v3582_v24  ;;  %3449 = vmatprep.mubr.msk.bf16.mxu1 %vm3693_vm4, %v3692_v11 }
0x11bb   :  { %3447 = vmatprep.subr.bf16.mxu1 %v3692_v11 }
0x11bc   :  { %3440 = vmatpush3.bf16.msra.mxu0 %v3583_v27 }
0x11bd   :  { %3453 = vmatprep.subr.bf16.mxu0 %v3692_v11 }
0x11be   :  { %3448 = vmatpush3.bf16.msra.mxu1 %v3584_v28 }
0x11bf   :  { %3442 = vmatmul.mubr.msk.bf16.vlgmr.msra.gmra.mrb[52].mxu0 %vm203_vm3, %v4168_v17  ;;  %3461 = vmatprep.subr.bf16.mxu1 %v3692_v11 }
0x11c0   :  { %3454 = vmatpush3.bf16.msra.mxu0 %v3585_v29  ;;  %3457 = vmatprep.mubr.msk.bf16.mxu0 %vm3693_vm4, %v3692_v11 }
0x11c1   :  { %3450 = vmatmul.mubr.msk.bf16.vlgmr.msra.gmra.mrb[52].mxu1 %vm203_vm3, %v4168_v17  ;;  %3455 = vmatprep.subr.bf16.mxu0 %v3692_v11 }
0x11c2   :  { %3463 = vmatprep.mubr.msk.bf16.mxu1 %vm3693_vm4, %v3692_v11 }
0x11c4   :  { %3456 = vmatpush3.bf16.msra.mxu0 %v3586_v32 }
0x11c5   :  { %3467 = vmatprep.subr.bf16.mxu0 %v3692_v11 }
0x11c7   :  { %3458 = vmatmul.mubr.msk.bf16.vlgmr.msra.gmra.mrb[56].mxu0 %vm203_vm3, %v4168_v17  ;;  %v3069_v17 = vld [vmem:[%s4477_s5 + $0x3] ss:$0 sm:$0xff] }
0x11c8   :  { %3469 = vmatprep.mubr.msk.bf16.mxu0 %vm3693_vm4, %v3692_v11 }
0x128a   :  { %v4258_v33 = vpop.f32.mrb[48].mxu0 }
0x128b   :  { %v3429_v34 = vpop.f32.mrb[49].mxu0 }
0x128c   :  { %v1901_v36 = vpop.f32.mrb[50].mxu0  ;;  %v4260_v37 = vpop.f32.mrb[48].mxu1 }
0x128d   :  { %v1950_v38 = vpack.c.bf16 %v4260_v37, %v4258_v33  ;;  %v3430_v39 = vpop.f32.mrb[51].mxu0  ;;  %v3435_v40 = vpop.f32.mrb[49].mxu1 }
0x128e   :  { %v1947_v41 = vpop.f32.mrb[50].mxu1 }
0x128f   :  { %v3436_v42 = vpop.f32.mrb[51].mxu1 }
0x1292   :  { %v2013_v44 = vpop.f32.mrb[52].mxu0 }
0x1293   :  { %v3443_v45 = vpop.f32.mrb[53].mxu0  ;;  %v2014_v57 = vadd.f32 %v3060_v52, %v2013_v44 }
0x1294   :  { %v2016_v46 = vpop.f32.mrb[54].mxu0  ;;  %v2079_v43 = vpop.f32.mrb[52].mxu1  ;;  %v3588_v45 = vld [vmem:[%s4432_s13 + $0x18] sm:$0xff]  }
0x1295   :  { %v2080_v47 = vadd.f32 %v3069_v17, %v2079_v43  ;;  %v3444_v49 = vpop.f32.mrb[55].mxu0  ;;  %v3451_v50 = vpop.f32.mrb[53].mxu1  ;;  %v2017_v63 = vadd.f32 %v3060_v52, %v2016_v46  ;;  %v2152_v3 = vpack.c.bf16 %v2014_v57, %v2014_v57 }
0x1296   :  { %v2082_v26 = vpop.f32.mrb[54].mxu1 }
0x1297   :  { %v2154_v30 = vpack.c.bf16 %v2080_v47, %v2080_v47  ;;  %v2083_v31 = vadd.f32 %v3069_v17, %v2082_v26  ;;  %v3452_v51 = vpop.f32.mrb[55].mxu1  ;;  %v2153_v5 = vpack.c.bf16 %v2017_v63, %v2017_v63  ;;  %v3587_v47 = vld [vmem:[%s4432_s13 + $0x10] sm:$0xff]  }
0x1299   :  { %v2162_v54 = vsel %vm475_vm5, %v2154_v30, 0  ;;  %v2155_v16 = vpack.c.bf16 %v2083_v31, %v2083_v31 }
0x129a   :  { %v2145_v56 = vpop.f32.mrb[56].mxu0  ;;  %3462 = vmatpush3.bf16.xpose.msra.mxu1 %v2162_v54 }
0x129b   :  { %v2208_v62 = vsel %vm475_vm5, %v2155_v16, 0  ;;  %v2146_v35 = vadd.f32 %v3078_v53, %v2145_v56  ;;  %v3459_v58 = vpop.f32.mrb[57].mxu0  ;;  %3473 = vmatprep.subr.bf16.mxu1 %v3692_v11 }
0x129c   :  { %v2148_v61 = vpop.f32.mrb[58].mxu0  ;;  %3468 = vmatpush3.bf16.xpose.msra.mxu0 %v2208_v62  ;;  %v3093_v62 = vld [vmem:[%s4433_s14 + $0x1] ss:$0 sm:$0xff] }
0x129d   :  { %v2156_v0 = vpack.c.bf16 %v2146_v35, %v2146_v35  ;;  %v2149_v1 = vadd.f32 %v3078_v53, %v2148_v61  ;;  %v3460_v2 = vpop.f32.mrb[59].mxu0  ;;  %3479 = vmatprep.subr.bf16.mxu0 %v3692_v11 }
0x129f   :  { %v2157_v4 = vpack.c.bf16 %v2149_v1, %v2149_v1  ;;  %v2282_v6 = vsel %vm610_vm6, %v2156_v0, 0 }
0x12a1   :  { %3464 = vmatmul.mubr.msk.bf16.vlgmr.msra.gmra.mrb[56].mxu1 %vm475_vm5, %v2152_v3  ;;  %v2328_v7 = vsel %vm610_vm6, %v2157_v4, 0 }
0x12a2   :  { %3474 = vmatpush3.bf16.msra.mxu1 %v2282_v6  ;;  %3475 = vmatprep.mubr.msk.bf16.mxu1 %vm3693_vm4, %v3692_v11 }
0x12a3   :  { %3470 = vmatmul.mubr.msk.bf16.vlgmr.msra.gmra.mrb[60].mxu0 %vm475_vm5, %v2153_v5  ;;  %3485 = vmatprep.subr.bf16.mxu1 %v3692_v11 }
0x12a4   :  { %3480 = vmatpush3.bf16.msra.mxu0 %v2328_v7  ;;  %3481 = vmatprep.mubr.msk.bf16.mxu0 %vm3693_vm4, %v3692_v11 }
0x12a5   :  { %3491 = vmatprep.subr.bf16.mxu0 %v3692_v11 }
0x1374   :  { %v2198_v8 = vpop.f32.mrb[56].mxu1 }
0x1375   :  { %v2250_v9 = vmul.f32 0.25, %v2198_v8  ;;  %v3465_v10 = vpop.f32.mrb[57].mxu1 }
0x1376   :  { %v2201_v12 = vpop.f32.mrb[58].mxu1  ;;  %v2244_v13 = vpop.f32.mrb[60].mxu0 }
0x1377   :  { %v2251_v14 = vmul.f32 0.25, %v2244_v13  ;;  %v3466_v60 = vpop.f32.mrb[59].mxu1  ;;  %v3471_v18 = vpop.f32.mrb[61].mxu0  ;;  %v2252_v19 = vadd.f32 %v2250_v9, %v3966_v55 }
0x1378   :  { %v2247_v20 = vpop.f32.mrb[62].mxu0 }
0x1379   :  { %v3472_v21 = vpop.f32.mrb[63].mxu0  ;;  %v2254_v22 = vsel %vm582_vm7, %v2252_v19, -inf  ;;  %v2253_v23 = vadd.f32 %v2251_v14, %v3964_v48 }
0x137a   :  { %2255 = vmax.xlane.f32.xlu1 %v2254_v22 }
0x137b   :  { %v2257_v24 = vsel %vm582_vm7, %v2253_v23, -inf }
0x137c   :  { %2258 = vmax.xlane.f32.xlu0 %v2257_v24 }
0x1407   :  { %v2256_v25 = vpop.xlane.xlu1 %2255 }
0x1408   :  { %v2260_v27 = vsub.f32 %v2252_v19, %v2256_v25  ;;  %v3590_v19 = vld [vmem:[%s4436_s17 + $0x18] sm:$0xff]  }
0x1409   :  { %v2259_v28 = vpop.xlane.xlu0 %2258 }
0x140a   :  { %v2262_v29 = vmul.f32 1.442695, %v2260_v27  ;;  %v2261_v32 = vsub.f32 %v2253_v23, %v2259_v28  ;;  %v3096_v28 = vld [vmem:[%s4434_s15 + $0x1] ss:$0 sm:$0xff] }
0x140c   :  { %3643 = vpow2.f32 %v2262_v29  ;;  %v2264_v34 = vmul.f32 1.442695, %v2261_v32 }
0x140e   :  { %3645 = vpow2.f32 %v2264_v34 }
0x1416   :  { %v3644_v36 = vpop.eup %3643 }
0x1417   :  { %v2266_v55 = vsel %vm582_vm7, %v3644_v36, 0.0 }
0x1418   :  { %v3646_v39 = vpop.eup %3645  ;;  %2267 = vadd.xlane.f32.xlu1 %v2266_v55  ;;  %v3097_v55 = vld [vmem:[%s4435_s16 + $0x1] ss:$0 sm:$0xff] }
0x1419   :  { %v2269_v40 = vsel %vm582_vm7, %v3646_v39, 0.0 }
0x141a   :  { %2270 = vadd.xlane.f32.xlu0 %v2269_v40 }
0x14a5   :  { %v2268_v48 = vpop.xlane.xlu1 %2267 }
0x14a6   :  { %3647 = vrcp.f32 %v2268_v48 }
0x14a7   :  { %v2271_v41 = vpop.xlane.xlu0 %2270 }
0x14a8   :  { %3649 = vrcp.f32 %v2271_v41 }
0x14b0   :  { %v3648_v42 = vpop.eup %3647 }
0x14b1   :  { %v2274_v44 = vmul.f32 %v3648_v42, %v3644_v36  ;;  %v3591_v42 = vld [vmem:[%s4438_s19 + $0x20] sm:$0xff]  }
0x14b2   :  { %v3650_v17 = vpop.eup %3649 }
0x14b3   :  { %v2275_v46 = vmul.f32 %v3650_v17, %v3646_v39  ;;  %v2276_v43 = vpack.c.bf16 %v2274_v44, %v2274_v44  ;;  %v3592_v44 = vld [vmem:[%s4438_s19 + $0x28] sm:$0xff]   ;;  %v3593_v17 = vld [vmem:[%s4438_s19 + $0x30] sm:$0xff]  }
0x14b5   :  { %3476 = vmatmul.mubr.msk.bf16.vlgmr.msra.gmra.mrb[60].mxu1 %vm582_vm7, %v2276_v43  ;;  %v2277_v49 = vpack.c.bf16 %v2275_v46, %v2275_v46  ;;  %v3103_v46 = vld [vmem:[%s4437_s18 + $0x1] ss:$0 sm:$0xff] }
0x14b6   :  { %3486 = vmatpush3.bf16.msra.mxu1 %v3588_v45  ;;  %3487 = vmatprep.mubr.msk.bf16.mxu1 %vm3693_vm4, %v3692_v11  ;;  %v3594_v45 = vld [vmem:[%s4438_s19 + $0x38] sm:$0xff]  }
0x14b7   :  { %3482 = vmatmul.mubr.msk.bf16.vlgmr.msra.gmra.mrb[64].mxu0 %vm582_vm7, %v2277_v49  ;;  %3497 = vmatprep.subr.bf16.mxu1 %v3692_v11 }
0x14b8   :  { %3492 = vmatpush3.bf16.msra.mxu0 %v3587_v47  ;;  %3493 = vmatprep.mubr.msk.bf16.mxu0 %vm3693_vm4, %v3692_v11 }
0x14b9   :  { %3505 = vmatprep.subr.bf16.mxu0 %v3692_v11 }
0x14bf   :  { %3494 = vmatmul.mubr.msk.bf16.vlgmr.msra.gmra.mrb[68].mxu0 %vm475_vm5, %v1950_v38 }
0x14c0   :  { %3513 = vmatprep.mubr.msk.bf16.mxu0 %vm3693_vm4, %v3692_v11  ;;  %3506 = vmatpush3.bf16.msra.mxu0 %v3591_v42 }
0x14c1   :  { %3507 = vmatprep.subr.bf16.mxu0 %v3692_v11 }
0x14c4   :  { %3508 = vmatpush3.bf16.msra.mxu0 %v3592_v44  ;;  %v3116_v44 = vld [vmem:[%s4439_s20 + $0x1] ss:$0 sm:$0xff] }
0x14c5   :  { %3509 = vmatprep.subr.bf16.mxu0 %v3692_v11 }
0x14c8   :  { %3510 = vmatpush3.bf16.msra.mxu0 %v3593_v17 }
0x14c9   :  { %3511 = vmatprep.subr.bf16.mxu0 %v3692_v11 }
0x14cc   :  { %3512 = vmatpush3.bf16.msra.mxu0 %v3594_v45 }
0x1588   :  { %v2318_v50 = vpop.f32.mrb[60].mxu1 }
0x1589   :  { %v3477_v26 = vpop.f32.mrb[61].mxu1 }
0x158a   :  { %v2321_v30 = vpop.f32.mrb[62].mxu1  ;;  %v2364_v31 = vpop.f32.mrb[64].mxu0 }
0x158b   :  { %v2370_v51 = vpack.c.bf16 %v2364_v31, %v2318_v50  ;;  %v3478_v52 = vpop.f32.mrb[63].mxu1  ;;  %v3483_v53 = vpop.f32.mrb[65].mxu0 }
0x158c   :  { %v2367_v54 = vpop.f32.mrb[66].mxu0 }
0x158d   :  { %v3484_v16 = vpop.f32.mrb[67].mxu0  ;;  %3488 = vmatmul.mubr.msk.bf16.vlgmr.msra.gmra.mrb[64].mxu1 %vm475_vm5, %v2370_v51 }
0x158e   :  { %3501 = vmatprep.mubr.msk.bf16.mxu1 %vm3693_vm4, %v3692_v11 }
0x1592   :  { %v2467_v33 = vpop.f32.mrb[68].mxu0 }
0x1593   :  { %v3495_v37 = vpop.f32.mrb[69].mxu0 }
0x1594   :  { %v2470_v38 = vpop.f32.mrb[70].mxu0 }
0x1595   :  { %v3496_v56 = vpop.f32.mrb[71].mxu0 }
0x1660   :  { %v2417_v57 = vpop.f32.mrb[64].mxu1 }
0x1661   :  { %v2468_v35 = vadd.f32 %v2467_v33, %v2417_v57  ;;  %v3489_v58 = vpop.f32.mrb[65].mxu1 }
0x1662   :  { %v2420_v61 = vpop.f32.mrb[66].mxu1 }
0x1663   :  { %v2482_v63 = vadd.f32 %v3093_v62, %v2468_v35  ;;  %v2471_v0 = vadd.f32 %v2470_v38, %v2420_v61  ;;  %v3490_v1 = vpop.f32.mrb[67].mxu1 }
0x1665   :  { %v2483_v2 = vadd.f32 %v3093_v62, %v2471_v0  ;;  %v2484_v3 = vadd.f32 %v2482_v63, %v4159_v15 }
0x1667   :  { %v2490_v4 = vsel %vm203_vm3, %v2484_v3, 0.0  ;;  %v2485_v5 = vadd.f32 %v2483_v2, %v4161_v59  ;;  %v3589_v59 = vld [vmem:[%s4436_s17 + $0x10] sm:$0xff]  }
0x1668   :  { %2491 = vadd.xlane.f32.xlu1 %v2490_v4  ;;  %3498 = vmatpush3.bf16.msra.mxu1 %v3589_v59 }
0x1669   :  { %v2493_v6 = vsel %vm203_vm3, %v2485_v5, 0.0  ;;  %3499 = vmatprep.subr.bf16.mxu1 %v3692_v11 }
0x166a   :  { %2494 = vadd.xlane.f32.xlu0 %v2493_v6 }
0x166c   :  { %3500 = vmatpush3.bf16.msra.mxu1 %v3590_v19 }
0x166d   :  { %3517 = vmatprep.subr.bf16.mxu1 %v3692_v11 }
0x16f5   :  { %v2492_v7 = vpop.xlane.xlu1 %2491 }
0x16f6   :  { %v2496_v8 = vmul.f32 0.03125, %v2492_v7 }
0x16f7   :  { %v2495_v9 = vpop.xlane.xlu0 %2494 }
0x16f8   :  { %v2498_v10 = vsub.f32 %v2484_v3, %v2496_v8  ;;  %v2497_v12 = vmul.f32 0.03125, %v2495_v9 }
0x16fa   :  { %v2499_v13 = vsub.f32 %v2485_v5, %v2497_v12  ;;  %v2500_v14 = vmul.f32 %v2498_v10, %v2498_v10 }
0x16fc   :  { %v2502_v60 = vsel %vm203_vm3, %v2500_v14, 0.0  ;;  %v2501_v18 = vmul.f32 %v2499_v13, %v2499_v13 }
0x16fd   :  { %2503 = vadd.xlane.f32.xlu1 %v2502_v60 }
0x16fe   :  { %v2505_v15 = vsel %vm203_vm3, %v2501_v18, 0.0 }
0x16ff   :  { %2506 = vadd.xlane.f32.xlu0 %v2505_v15 }
0x178a   :  { %v2504_v20 = vpop.xlane.xlu1 %2503 }
0x178b   :  { %v2508_v21 = vmul.f32 0.03125, %v2504_v20 }
0x178c   :  { %v2507_v22 = vpop.xlane.xlu0 %2506 }
0x178d   :  { %v2510_v23 = vadd.f32 1e-12, %v2508_v21  ;;  %v2509_v24 = vmul.f32 0.03125, %v2507_v22 }
0x178f   :  { %3651 = vrsqrt.f32 %v2510_v23  ;;  %v2511_v25 = vadd.f32 1e-12, %v2509_v24 }
0x1791   :  { %3653 = vrsqrt.f32 %v2511_v25 }
0x1799   :  { %v3652_v27 = vpop.eup %3651 }
0x179a   :  { %v2514_v29 = vmul.f32 %v3652_v27, %v2498_v10 }
0x179b   :  { %v3654_v32 = vpop.eup %3653 }
0x179c   :  { %v2522_v34 = vmul.f32 %v3096_v28, %v2514_v29  ;;  %v2515_v36 = vmul.f32 %v3654_v32, %v2499_v13 }
0x179e   :  { %v2523_v39 = vmul.f32 %v3096_v28, %v2515_v36  ;;  %v4339_v40 = vadd.f32 %v3097_v55, %v2522_v34 }
0x17a0   :  { %v4341_v48 = vadd.f32 %v3097_v55, %v2523_v39 }
0x17a2   :  { %v2532_v41 = vpack.c.bf16 %v4341_v48, %v4339_v40 }
0x17a4   :  { %3502 = vmatmul.mubr.msk.bf16.vlgmr.msra.gmra.mrb[68].mxu1 %vm203_vm3, %v2532_v41 }
0x17a5   :  { %3521 = vmatprep.mubr.msk.bf16.mxu1 %vm3693_vm4, %v3692_v11 }
0x1877   :  { %v2595_v43 = vpop.f32.mrb[68].mxu1 }
0x1878   :  { %v2596_v47 = vadd.f32 %v3103_v46, %v2595_v43  ;;  %v3503_v49 = vpop.f32.mrb[69].mxu1 }
0x1879   :  { %v2598_v50 = vpop.f32.mrb[70].mxu1 }
0x187a   :  { %v2604_v26 = vmul.f32 0.70710677, %v2596_v47  ;;  %v2599_v30 = vadd.f32 %v3103_v46, %v2598_v50  ;;  %v3504_v31 = vpop.f32.mrb[71].mxu1  ;;  %v2602_v34 = vmul.f32 0.5, %v2596_v47 }
0x187c   :  { %v2606_v51 = vand.u32 2147483647, %v2604_v26  ;;  %v2605_v52 = vmul.f32 0.70710677, %v2599_v30  ;;  %vm2646_vm10 = vcmp.ge.f32.partialorder %v2604_v26, 0.0  ;;  %v2603_v36 = vmul.f32 0.5, %v2599_v30 }
0x187e   :  { %v2608_v53 = vmul.f32 0.3275911, %v2606_v51  ;;  %v2607_v54 = vand.u32 2147483647, %v2605_v52  ;;  %v2634_v38 = vsub.f32 0.0, %v2606_v51  ;;  %vm2647_vm11 = vcmp.ge.f32.partialorder %v2605_v52, 0.0 }
0x1880   :  { %v2610_v16 = vadd.f32 1.0, %v2608_v53  ;;  %v2609_v33 = vmul.f32 0.3275911, %v2607_v54  ;;  %v2635_v56 = vsub.f32 0.0, %v2607_v54  ;;  %v2636_v62 = vmul.f32 %v2634_v38, %v2606_v51 }
0x1882   :  { %3655 = vrcp.f32 %v2610_v16  ;;  %v2611_v37 = vadd.f32 1.0, %v2609_v33  ;;  %v2637_v63 = vmul.f32 %v2635_v56, %v2607_v54  ;;  %v2638_v0 = vmul.f32 1.442695, %v2636_v62 }
0x1884   :  { %3657 = vrcp.f32 %v2611_v37  ;;  %v2640_v5 = vmul.f32 1.442695, %v2637_v63 }
0x1885   :  { %3659 = vpow2.f32 %v2638_v0 }
0x1886   :  { %3661 = vpow2.f32 %v2640_v5  ;;  %v3125_v5 = vld [vmem:[%s4480_s30 + $0x1] ss:$0 sm:$0xff] }
0x188c   :  { %v3656_v57 = vpop.eup %3655 }
0x188d   :  { %v2616_v35 = vmul.f32 1.0614054, %v3656_v57 }
0x188e   :  { %v3658_v58 = vpop.eup %3657 }
0x188f   :  { %v2618_v61 = vadd.f32 -1.4531521, %v2616_v35  ;;  %v2617_v1 = vmul.f32 1.0614054, %v3658_v58  ;;  %v3660_v15 = vpop.eup %3659 }
0x1890   :  { %v3662_v21 = vpop.eup %3661 }
0x1891   :  { %v2620_v2 = vmul.f32 %v3656_v57, %v2618_v61  ;;  %v2619_v3 = vadd.f32 -1.4531521, %v2617_v1 }
0x1893   :  { %v2622_v4 = vadd.f32 1.4214138, %v2620_v2  ;;  %v2621_v6 = vmul.f32 %v3658_v58, %v2619_v3  ;;  %v3124_v2 = vld [vmem:[%s4440_s21 + $0x1] ss:$0 sm:$0xff] }
0x1895   :  { %v2624_v7 = vmul.f32 %v3656_v57, %v2622_v4  ;;  %v2623_v8 = vadd.f32 1.4214138, %v2621_v6 }
0x1897   :  { %v2626_v9 = vadd.f32 -0.28449672, %v2624_v7  ;;  %v2625_v10 = vmul.f32 %v3658_v58, %v2623_v8 }
0x1899   :  { %v2628_v12 = vmul.f32 %v3656_v57, %v2626_v9  ;;  %v2627_v13 = vadd.f32 -0.28449672, %v2625_v10 }
0x189b   :  { %v2630_v14 = vadd.f32 0.2548296, %v2628_v12  ;;  %v2629_v60 = vmul.f32 %v3658_v58, %v2627_v13 }
0x189d   :  { %v2632_v18 = vmul.f32 %v3656_v57, %v2630_v14  ;;  %v2631_v59 = vadd.f32 0.2548296, %v2629_v60  ;;  %v3596_v57 = vld [vmem:[%s4442_s23 + $0x8] sm:$0xff]  }
0x189f   :  { %v2642_v19 = vmul.f32 %v3660_v15, %v2632_v18  ;;  %v2633_v20 = vmul.f32 %v3658_v58, %v2631_v59 }
0x18a1   :  { %v2644_v22 = vsub.f32 1.0, %v2642_v19  ;;  %v2643_v23 = vmul.f32 %v3662_v21, %v2633_v20  ;;  %v3597_v19 = vld [vmem:[%s4444_s25] sm:$0xff]   ;;  %v3598_v20 = vld [vmem:[%s4444_s25 + $0x8] sm:$0xff]   ;;  %s2941_s25 = sshll.u32 %s3695_s9, 4  ;;  %s2942_s25 = int_to_ptr.vmem [resolvable:$true] %s2941_s25 }
0x18a2   :  { %v3126_v21 = vld [vmem:[%s4443_s24] ss:$0 sm:$0xff]  ;;  %s3667_s24 = scalar_lea.vmem %s2942_s25, 32  ;;  %p3672_p1 = scmp.lt.s32.totalorder %s2942_s25, %s2942_s25 }
0x18a3   :  { %v2648_v24 = vsub.f32 0.0, %v2644_v22  ;;  %v2645_v25 = vsub.f32 1.0, %v2643_v23  ;;  %p3668_p0 = scmp.ne.s32.totalorder %s2942_s25, %s3667_s24  ;;  %p3673_p2 = scmp.lt.s32.totalorder %s3667_s24, %s3667_s24 }
0x18a5   :  { %v2650_v27 = vsel %vm2646_vm10, %v2644_v22, %v2648_v24  ;;  %v2649_v28 = vsub.f32 0.0, %v2645_v25  ;;  %p3674_p3 = por %p3673_p2, %p3672_p1 }
0x18a6   :  { %v2652_v29 = vadd.f32 1.0, %v2650_v27 }
0x18a7   :  { %v2651_v32 = vsel %vm2647_vm11, %v2645_v25, %v2649_v28  ;;  %p3675_p4 = pnand %p3674_p3, %p3668_p0 }
0x18a8   :  { %v2653_v55 = vadd.f32 1.0, %v2651_v32  ;;  %v2654_v39 = vmul.f32 %v2652_v29, %v2602_v34 }
0x18aa   :  { %v2655_v41 = vmul.f32 %v2653_v55, %v2603_v36 }
0x18ac   :  { %v2656_v42 = vpack.c.bf16 %v2655_v41, %v2654_v39 }
0x18ae   :  { %3514 = vmatmul.mubr.msk.bf16.vlgmr.msra.gmra.mrb[72].mxu0 %vm110_vm0, %v2656_v42 }
0x1981   :  { %v2735_v17 = vpop.f32.mrb[72].mxu0 }
0x1982   :  { %v2736_v45 = vadd.f32 %v3116_v44, %v2735_v17  ;;  %v3515_v46 = vpop.f32.mrb[73].mxu0 }
0x1983   :  { %v2738_v43 = vpop.f32.mrb[74].mxu0 }
0x1984   :  { %v2739_v49 = vadd.f32 %v3116_v44, %v2738_v43  ;;  %v3516_v50 = vpop.f32.mrb[75].mxu0  ;;  %v2742_v26 = vadd.f32 %v2736_v45, %v4339_v40 }
0x1986   :  { %v2748_v47 = vsel %vm203_vm3, %v2742_v26, 0.0  ;;  %v2743_v30 = vadd.f32 %v2739_v49, %v4341_v48  ;;  %v3595_v48 = vld [vmem:[%s4442_s23] sm:$0xff]  }
0x1987   :  { %2749 = vadd.xlane.f32.xlu0 %v2748_v47  ;;  %3518 = vmatpush3.bf16.msra.mxu1 %v3595_v48 }
0x1988   :  { %v2751_v31 = vsel %vm203_vm3, %v2743_v30, 0.0  ;;  %3519 = vmatprep.subr.bf16.mxu1 %v3692_v11 }
0x1989   :  { %2752 = vadd.xlane.f32.xlu1 %v2751_v31 }
0x198b   :  { %3520 = vmatpush3.bf16.msra.mxu1 %v3596_v57 }
0x198c   :  { %3525 = vmatprep.subr.bf16.mxu1 %v3692_v11 }
0x1a14   :  { %v2750_v51 = vpop.xlane.xlu0 %2749 }
0x1a15   :  { %v2754_v52 = vmul.f32 0.03125, %v2750_v51 }
0x1a16   :  { %v2753_v53 = vpop.xlane.xlu1 %2752 }
0x1a17   :  { %v2756_v54 = vsub.f32 %v2742_v26, %v2754_v52  ;;  %v2755_v16 = vmul.f32 0.03125, %v2753_v53 }
0x1a19   :  { %v2757_v33 = vsub.f32 %v2743_v30, %v2755_v16  ;;  %v2758_v37 = vmul.f32 %v2756_v54, %v2756_v54 }
0x1a1b   :  { %v2760_v38 = vsel %vm203_vm3, %v2758_v37, 0.0  ;;  %v2759_v56 = vmul.f32 %v2757_v33, %v2757_v33 }
0x1a1c   :  { %2761 = vadd.xlane.f32.xlu0 %v2760_v38 }
0x1a1d   :  { %v2763_v40 = vsel %vm203_vm3, %v2759_v56, 0.0 }
0x1a1e   :  { %2764 = vadd.xlane.f32.xlu1 %v2763_v40 }
0x1aa9   :  { %v2762_v62 = vpop.xlane.xlu0 %2761 }
0x1aaa   :  { %v2766_v35 = vmul.f32 0.03125, %v2762_v62 }
0x1aab   :  { %v2765_v58 = vpop.xlane.xlu1 %2764 }
0x1aac   :  { %v2768_v61 = vadd.f32 1e-12, %v2766_v35  ;;  %v2767_v63 = vmul.f32 0.03125, %v2765_v58 }
0x1aae   :  { %3663 = vrsqrt.f32 %v2768_v61  ;;  %v2769_v0 = vadd.f32 1e-12, %v2767_v63 }
0x1ab0   :  { %3665 = vrsqrt.f32 %v2769_v0 }
0x1ab8   :  { %v3664_v1 = vpop.eup %3663 }
0x1ab9   :  { %v2772_v3 = vmul.f32 %v3664_v1, %v2756_v54 }
0x1aba   :  { %v3666_v4 = vpop.eup %3665 }
0x1abb   :  { %v2780_v6 = vmul.f32 %v3124_v2, %v2772_v3  ;;  %v2773_v7 = vmul.f32 %v3666_v4, %v2757_v33 }
0x1abd   :  { %v2788_v8 = vadd.f32 %v3125_v5, %v2780_v6  ;;  %v2781_v9 = vmul.f32 %v3124_v2, %v2773_v7 }
0x1abf   :  { %v2789_v10 = vadd.f32 %v3125_v5, %v2781_v9  ;;  %v2790_v12 = vpack.c.bf16 %v2788_v8, %v2788_v8 }
0x1ac1   :  { %v2791_v13 = vpack.c.bf16 %v2789_v10, %v2789_v10  ;;  %v2805_v60 = vunpack.c.l.b16 %v2790_v12 }
0x1ac3   :  { %v2806_v14 = vunpack.c.l.b16 %v2791_v13 }
0x1ac5   :  { %v2807_v18 = vrot.slane %v2806_v14, 7 }
0x1ac7   :  { %v2809_v15 = vsel %vm2808_vm12, %v2807_v18, %v2805_v60 }
0x1ac8   :  { %v2810_v59 = vpack.c.b16 %v2809_v15, %v2809_v15 }
0x1aca   :  { %3522 = vmatmul.mubr.msk.bf16.vlgmr.msra.gmra.mrb[72].mxu1 %vm203_vm3, %v2810_v59 }
0x1acb   :  { %3529 = vmatprep.mubr.msk.bf16.mxu1 %vm3693_vm4, %v3692_v11  ;;  %3526 = vmatpush3.bf16.msra.mxu1 %v3597_v19 }
0x1acc   :  { %3527 = vmatprep.subr.bf16.mxu1 %v3692_v11  ;;  %v3130_v11 = vld [vmem:[%s4445_s26] ss:$0 sm:$0xff] }
0x1acf   :  { %3528 = vmatpush3.bf16.msra.mxu1 %v3598_v20 }
0x1b9d   :  { %v2860_v22 = vpop.f32.mrb[72].mxu1 }
0x1b9e   :  { %v2861_v23 = vadd.f32 %v3126_v21, %v2860_v22  ;;  %v3523_v24 = vpop.f32.mrb[73].mxu1 }
0x1b9f   :  { %v2863_v25 = vpop.f32.mrb[74].mxu1 }
0x1ba0   :  { %v2866_v27 = vmax.f32 %v2861_v23, 0.0  ;;  %v3524_v28 = vpop.f32.mrb[75].mxu1 }
0x1ba2   :  { %v2867_v29 = vpack.c.bf16 %v2866_v27, %v2866_v27 }
0x1ba4   :  { %3530 = vmatmul.mubr.msk.bf16.vlgmr.msra.gmra.mrb[76].mxu1 %vm203_vm3, %v2867_v29 }
0x1c77   :  { %v2928_v32 = vpop.f32.mrb[76].mxu1 }
0x1c78   :  { %v2929_v34 = vadd.f32 %v3130_v11, %v2928_v32  ;;  %v3531_v36 = vpop.f32.mrb[77].mxu1 }
0x1c79   :  { %v2931_v55 = vpop.f32.mrb[78].mxu1 }
0x1c7a   :  { %2934 = vst [vmem:[#allocation2] sm:$0x3] %v2929_v34  ;;  %v3532_v39 = vpop.f32.mrb[79].mxu1 }
0x1c7b   :  { %3678 = shalt.err (!%p3675_p4)
}
0x1c7c   :  { %s3679_s26 = scalar_lea.hbm %s4446_s27, 32 }
0x1c7d   :  { %p3680_p5 = scmp.ne.s32.totalorder %s4446_s27, %s3679_s26  ;;  %p3683_p6 = scmp.lt.u32.totalorder %s3679_s26, %s4446_s27 }
0x1c7f   :  { %p3685_p7 = pnand %p3683_p6, %p3680_p5 }
0x1c81   :  { %3688 = shalt.err (!%p3685_p7)
}
0x1c82   :  { %2944 = dma.vmem_to_hbm [thread:$0]  %s2942_s25, 32, %s4446_s27, [#allocation3]  }
0x1c83   :  { %3689 = dma.done.wait [#allocation3], 32  }
0x1c84   :  { %3690 = vsyncadd [#allocation3], 4294967264 }
0x1c85   :  { %2948 = vsyncpa [#allocation3], 1 }

</bundles_post_ra>
